<compile_context>
chip_gen: v7x
topology: tpu7x:2x2x1
jax: 0.10.0
libtpu: 0.0.40
codegen_flags: <defaults>
</compile_context>

<pallas_src>
from functools import partial

import jax
import jax.numpy as jnp
from jax import lax
from jax.experimental import pallas as pl
from jax.experimental.pallas import tpu as pltpu

HIDDEN = 128
N_HEADS = 8
HEAD_DIM = HIDDEN // N_HEADS
DROP_P = 0.1


def _attn_kernel(q_ref, k_ref, v_ref, wq_ref, bq_ref, drop_ref, o_ref, *,
                 n_heads, head_dim):
    """One grid step = one batch element; all heads handled lane-dense."""
    S = q_ref.shape[1]

    # Fused q projection for ALL heads at once: (S, 128) @ (128, 128) on the MXU.
    # The 1/sqrt(head_dim) q-scale is pre-folded into wq / bq by the wrapper.
    qh = (jnp.dot(q_ref[0], wq_ref[...], preferred_element_type=jnp.float32)
          + bq_ref[...])                      # (S, hidden)
    kf = k_ref[0]                             # (S, hidden), heads packed on lanes
    vf = v_ref[0]                             # (S, hidden)
    dm = drop_ref[0]                          # (S, n_heads*S) dropout multipliers

    outs = []
    for h in range(n_heads):                  # static unrolled loop over heads
        cs = slice(h * head_dim, (h + 1) * head_dim)   # static lane slice
        q_h = qh[:, cs]                                 # (S, D)
        k_h = kf[:, cs]                                 # (S, D)
        v_h = vf[:, cs]                                 # (S, D)

        # scores = q_h @ k_h.T (contract over head_dim, no explicit transpose)
        scores = lax.dot_general(q_h, k_h, (((1,), (1,)), ((), ())),
                                 preferred_element_type=jnp.float32)  # (S, S)
        scores = scores - jnp.max(scores, axis=-1, keepdims=True)
        p = jnp.exp(scores)
        attn = p * (1.0 / jnp.sum(p, axis=-1, keepdims=True))

        # dropout (p=DROP_P, training=True): mask is pre-scaled by 1/(1-p)
        attn = attn * dm[:, h * S:(h + 1) * S]

        outs.append(jnp.dot(attn, v_h, preferred_element_type=jnp.float32))

    # Single lane-dense (S, hidden) store: heads packed h-major / d-minor,
    # i.e. exactly the (b, s, h, d) memory order PyTorch's epilogue produces.
    o_ref[0] = jnp.concatenate(outs, axis=-1)


def model_forward(q, k, v, w_qkv, b_qkv, drop_key, *, n_heads=N_HEADS,
                  drop_p=DROP_P):
    B, S, hidden = q.shape
    D = hidden // n_heads
    scale = jnp.float32(D ** -0.5)

    # PyTorch Linear: y = x @ W.T + b, W is (3*hidden, hidden).  Take the
    # q-chunk and fold the 1/sqrt(D) q-scale into the weights/bias (exact: 0.25).
    wq = jnp.transpose(w_qkv[:hidden, :]) * scale        # (hidden, hidden)
    bq = (b_qkv[:hidden] * scale).reshape(1, hidden)     # (1, hidden)

    # Dropout keep-mask, pre-scaled by 1/(1-p), packed lane-dense as
    # (B, S, H*S): drop[b, i, h*S + j] multiplies attn[b, h, i, j].
    # TODO(synk): randomness is drawn host-side with jax.random because the
    # in-kernel pltpu.prng_* primitives have no interpret-mode lowering; the
    # mask multiply itself stays inside the kernel.
    keep = jax.random.bernoulli(drop_key, 1.0 - drop_p, (B, S, n_heads * S))
    drop_mask = keep.astype(jnp.float32) * jnp.float32(1.0 / (1.0 - drop_p))

    out_bsh = pl.pallas_call(
        partial(_attn_kernel, n_heads=n_heads, head_dim=D),
        out_shape=jax.ShapeDtypeStruct((B, S, hidden), jnp.float32),
        grid=(B,),
        in_specs=[
            pl.BlockSpec((1, S, hidden), lambda b: (b, 0, 0)),        # q
            pl.BlockSpec((1, S, hidden), lambda b: (b, 0, 0)),        # k
            pl.BlockSpec((1, S, hidden), lambda b: (b, 0, 0)),        # v
            pl.BlockSpec((hidden, hidden), lambda b: (0, 0)),         # wq
            pl.BlockSpec((1, hidden), lambda b: (0, 0)),              # bq
            pl.BlockSpec((1, S, n_heads * S), lambda b: (b, 0, 0)),   # dropout
        ],
        out_specs=pl.BlockSpec((1, S, hidden), lambda b: (b, 0, 0)),
        compiler_params=pltpu.CompilerParams(
            dimension_semantics=("parallel",)),
    )(q, k, v, wq, bq, drop_mask)

    # PyTorch epilogue: transpose(1,2) then reshape with the *pre-transpose*
    # sizes -> (B, n_heads, S*D) over (b, s, h, d)-ordered data.  Our kernel
    # output is already contiguous in that order, so this is a pure reshape.
    return out_bsh.reshape(B, n_heads, S * D)


if __name__ == "__main__":
    B, S = 2, 16
    key = jax.random.PRNGKey(0)
    kq, kk, kv, kw, kb, kd = jax.random.split(key, 6)

    q = jax.random.normal(kq, (B, S, HIDDEN), dtype=jnp.float32)
    k = jax.random.normal(kk, (B, S, HIDDEN), dtype=jnp.float32)
    v = jax.random.normal(kv, (B, S, HIDDEN), dtype=jnp.float32)

    # Deterministic "Linear(hidden, 3*hidden)" parameters.
    w_qkv = jax.random.normal(kw, (3 * HIDDEN, HIDDEN), dtype=jnp.float32) * 0.05
    b_qkv = jax.random.normal(kb, (3 * HIDDEN,), dtype=jnp.float32) * 0.01

    out = model_forward(q, k, v, w_qkv, b_qkv, kd)
    jax.block_until_ready(out)
    assert out.shape == (B, N_HEADS, S * HEAD_DIM), out.shape
    print("KERNEL_OK")
</pallas_src>

<mosaic_0001>
module attributes {stable_mosaic.version = 11 : i64} {
  func.func @_attn_kernel(%arg0: i32, %arg1: memref<1x16x128xf32, #tpu.memory_space<vmem>>, %arg2: memref<1x16x128xf32, #tpu.memory_space<vmem>>, %arg3: memref<1x16x128xf32, #tpu.memory_space<vmem>>, %arg4: memref<128x128xf32, #tpu.memory_space<vmem>>, %arg5: memref<1x128xf32, #tpu.memory_space<vmem>>, %arg6: memref<1x16x128xf32, #tpu.memory_space<vmem>>, %arg7: memref<1x16x128xf32, #tpu.memory_space<vmem>>) attributes {dimension_semantics = [#tpu.dimension_semantics<parallel>], iteration_bounds = array<i64: 2>, scalar_prefetch = 0 : i64, scratch_operands = 0 : i64, tpu.core_type = #tpu.core_type<tc>, window_params = [{transform_indices = @transform_0, window_bounds = array<i64: 1, 16, 128>}, {transform_indices = @transform_1, window_bounds = array<i64: 1, 16, 128>}, {transform_indices = @transform_2, window_bounds = array<i64: 1, 16, 128>}, {pipeline_mode = #tpu.pipeline_mode<synchronous>, transform_indices = @transform_3, window_bounds = array<i64: 128, 128>}, {pipeline_mode = #tpu.pipeline_mode<synchronous>, transform_indices = @transform_4, window_bounds = array<i64: 1, 128>}, {transform_indices = @transform_5, window_bounds = array<i64: 1, 16, 128>}, {transform_indices = @transform_6, window_bounds = array<i64: 1, 16, 128>}]} {
    %c0 = arith.constant 0 : index
    %c0_0 = arith.constant 0 : index
    %c0_1 = arith.constant 0 : index
    %0 = vector.load %arg1[%c0, %c0_0, %c0_1] : memref<1x16x128xf32, #tpu.memory_space<vmem>>, vector<1x16x128xf32>
    %1 = vector.shape_cast %0 : vector<1x16x128xf32> to vector<16x128xf32>
    %c0_2 = arith.constant 0 : index
    %c0_3 = arith.constant 0 : index
    %2 = vector.load %arg4[%c0_2, %c0_3] : memref<128x128xf32, #tpu.memory_space<vmem>>, vector<128x128xf32>
    %cst = arith.constant dense<0.000000e+00> : vector<16x128xf32>
    %3 = tpu.matmul %1, %2, %cst {dimension_numbers = #tpu.dot_dimension_numbers<[1], [0], [0], [1], [0, 0, 1, 1], [], []>} : vector<16x128xf32>, vector<128x128xf32>, vector<16x128xf32> -> vector<16x128xf32>
    %c0_4 = arith.constant 0 : index
    %c0_5 = arith.constant 0 : index
    %4 = vector.load %arg5[%c0_4, %c0_5] : memref<1x128xf32, #tpu.memory_space<vmem>>, vector<1x128xf32>
    %5 = vector.broadcast %4 : vector<1x128xf32> to vector<16x128xf32>
    %6 = arith.addf %3, %5 : vector<16x128xf32>
    %c0_6 = arith.constant 0 : index
    %c0_7 = arith.constant 0 : index
    %c0_8 = arith.constant 0 : index
    %7 = vector.load %arg2[%c0_6, %c0_7, %c0_8] : memref<1x16x128xf32, #tpu.memory_space<vmem>>, vector<1x16x128xf32>
    %8 = vector.shape_cast %7 : vector<1x16x128xf32> to vector<16x128xf32>
    %c0_9 = arith.constant 0 : index
    %c0_10 = arith.constant 0 : index
    %c0_11 = arith.constant 0 : index
    %9 = vector.load %arg3[%c0_9, %c0_10, %c0_11] : memref<1x16x128xf32, #tpu.memory_space<vmem>>, vector<1x16x128xf32>
    %10 = vector.shape_cast %9 : vector<1x16x128xf32> to vector<16x128xf32>
    %c0_12 = arith.constant 0 : index
    %c0_13 = arith.constant 0 : index
    %c0_14 = arith.constant 0 : index
    %11 = vector.load %arg6[%c0_12, %c0_13, %c0_14] : memref<1x16x128xf32, #tpu.memory_space<vmem>>, vector<1x16x128xf32>
    %12 = vector.shape_cast %11 : vector<1x16x128xf32> to vector<16x128xf32>
    %13 = vector.extract_strided_slice %6 {offsets = [0, 0], sizes = [16, 16], strides = [1, 1]} : vector<16x128xf32> to vector<16x16xf32>
    %14 = vector.extract_strided_slice %8 {offsets = [0, 0], sizes = [16, 16], strides = [1, 1]} : vector<16x128xf32> to vector<16x16xf32>
    %15 = vector.extract_strided_slice %10 {offsets = [0, 0], sizes = [16, 16], strides = [1, 1]} : vector<16x128xf32> to vector<16x16xf32>
    %cst_15 = arith.constant dense<0.000000e+00> : vector<16x16xf32>
    %16 = tpu.matmul %13, %14, %cst_15 {dimension_numbers = #tpu.dot_dimension_numbers<[1], [1], [0], [0], [0, 0, 1, 0], [], []>} : vector<16x16xf32>, vector<16x16xf32>, vector<16x16xf32> -> vector<16x16xf32>
    %cst_16 = arith.constant dense<0xFF800000> : vector<16xf32>
    %17 = vector.multi_reduction <maximumf>, %16, %cst_16 [1] : vector<16x16xf32> to vector<16xf32>
    %18 = vector.shape_cast %17 : vector<16xf32> to vector<16x1xf32>
    %19 = vector.broadcast %18 : vector<16x1xf32> to vector<16x16xf32>
    %20 = arith.subf %16, %19 : vector<16x16xf32>
    %21 = math.exp %20 : vector<16x16xf32>
    %cst_17 = arith.constant dense<0.000000e+00> : vector<16xf32>
    %22 = vector.multi_reduction <add>, %21, %cst_17 [1] : vector<16x16xf32> to vector<16xf32>
    %23 = vector.shape_cast %22 : vector<16xf32> to vector<16x1xf32>
    %cst_18 = arith.constant 1.000000e+00 : f32
    %24 = vector.broadcast %cst_18 : f32 to vector<16x1xf32>
    %25 = arith.divf %24, %23 : vector<16x1xf32>
    %26 = vector.broadcast %25 : vector<16x1xf32> to vector<16x16xf32>
    %27 = arith.mulf %21, %26 : vector<16x16xf32>
    %28 = vector.extract_strided_slice %12 {offsets = [0, 0], sizes = [16, 16], strides = [1, 1]} : vector<16x128xf32> to vector<16x16xf32>
    %29 = arith.mulf %27, %28 : vector<16x16xf32>
    %cst_19 = arith.constant dense<0.000000e+00> : vector<16x16xf32>
    %30 = tpu.matmul %29, %15, %cst_19 {dimension_numbers = #tpu.dot_dimension_numbers<[1], [0], [0], [1], [0, 0, 1, 1], [], []>} : vector<16x16xf32>, vector<16x16xf32>, vector<16x16xf32> -> vector<16x16xf32>
    %31 = vector.extract_strided_slice %6 {offsets = [0, 16], sizes = [16, 16], strides = [1, 1]} : vector<16x128xf32> to vector<16x16xf32>
    %32 = vector.extract_strided_slice %8 {offsets = [0, 16], sizes = [16, 16], strides = [1, 1]} : vector<16x128xf32> to vector<16x16xf32>
    %33 = vector.extract_strided_slice %10 {offsets = [0, 16], sizes = [16, 16], strides = [1, 1]} : vector<16x128xf32> to vector<16x16xf32>
    %cst_20 = arith.constant dense<0.000000e+00> : vector<16x16xf32>
    %34 = tpu.matmul %31, %32, %cst_20 {dimension_numbers = #tpu.dot_dimension_numbers<[1], [1], [0], [0], [0, 0, 1, 0], [], []>} : vector<16x16xf32>, vector<16x16xf32>, vector<16x16xf32> -> vector<16x16xf32>
    %cst_21 = arith.constant dense<0xFF800000> : vector<16xf32>
    %35 = vector.multi_reduction <maximumf>, %34, %cst_21 [1] : vector<16x16xf32> to vector<16xf32>
    %36 = vector.shape_cast %35 : vector<16xf32> to vector<16x1xf32>
    %37 = vector.broadcast %36 : vector<16x1xf32> to vector<16x16xf32>
    %38 = arith.subf %34, %37 : vector<16x16xf32>
    %39 = math.exp %38 : vector<16x16xf32>
    %cst_22 = arith.constant dense<0.000000e+00> : vector<16xf32>
    %40 = vector.multi_reduction <add>, %39, %cst_22 [1] : vector<16x16xf32> to vector<16xf32>
    %41 = vector.shape_cast %40 : vector<16xf32> to vector<16x1xf32>
    %cst_23 = arith.constant 1.000000e+00 : f32
    %42 = vector.broadcast %cst_23 : f32 to vector<16x1xf32>
    %43 = arith.divf %42, %41 : vector<16x1xf32>
    %44 = vector.broadcast %43 : vector<16x1xf32> to vector<16x16xf32>
    %45 = arith.mulf %39, %44 : vector<16x16xf32>
    %46 = vector.extract_strided_slice %12 {offsets = [0, 16], sizes = [16, 16], strides = [1, 1]} : vector<16x128xf32> to vector<16x16xf32>
    %47 = arith.mulf %45, %46 : vector<16x16xf32>
    %cst_24 = arith.constant dense<0.000000e+00> : vector<16x16xf32>
    %48 = tpu.matmul %47, %33, %cst_24 {dimension_numbers = #tpu.dot_dimension_numbers<[1], [0], [0], [1], [0, 0, 1, 1], [], []>} : vector<16x16xf32>, vector<16x16xf32>, vector<16x16xf32> -> vector<16x16xf32>
    %49 = vector.extract_strided_slice %6 {offsets = [0, 32], sizes = [16, 16], strides = [1, 1]} : vector<16x128xf32> to vector<16x16xf32>
    %50 = vector.extract_strided_slice %8 {offsets = [0, 32], sizes = [16, 16], strides = [1, 1]} : vector<16x128xf32> to vector<16x16xf32>
    %51 = vector.extract_strided_slice %10 {offsets = [0, 32], sizes = [16, 16], strides = [1, 1]} : vector<16x128xf32> to vector<16x16xf32>
    %cst_25 = arith.constant dense<0.000000e+00> : vector<16x16xf32>
    %52 = tpu.matmul %49, %50, %cst_25 {dimension_numbers = #tpu.dot_dimension_numbers<[1], [1], [0], [0], [0, 0, 1, 0], [], []>} : vector<16x16xf32>, vector<16x16xf32>, vector<16x16xf32> -> vector<16x16xf32>
    %cst_26 = arith.constant dense<0xFF800000> : vector<16xf32>
    %53 = vector.multi_reduction <maximumf>, %52, %cst_26 [1] : vector<16x16xf32> to vector<16xf32>
    %54 = vector.shape_cast %53 : vector<16xf32> to vector<16x1xf32>
    %55 = vector.broadcast %54 : vector<16x1xf32> to vector<16x16xf32>
    %56 = arith.subf %52, %55 : vector<16x16xf32>
    %57 = math.exp %56 : vector<16x16xf32>
    %cst_27 = arith.constant dense<0.000000e+00> : vector<16xf32>
    %58 = vector.multi_reduction <add>, %57, %cst_27 [1] : vector<16x16xf32> to vector<16xf32>
    %59 = vector.shape_cast %58 : vector<16xf32> to vector<16x1xf32>
    %cst_28 = arith.constant 1.000000e+00 : f32
    %60 = vector.broadcast %cst_28 : f32 to vector<16x1xf32>
    %61 = arith.divf %60, %59 : vector<16x1xf32>
    %62 = vector.broadcast %61 : vector<16x1xf32> to vector<16x16xf32>
    %63 = arith.mulf %57, %62 : vector<16x16xf32>
    %64 = vector.extract_strided_slice %12 {offsets = [0, 32], sizes = [16, 16], strides = [1, 1]} : vector<16x128xf32> to vector<16x16xf32>
    %65 = arith.mulf %63, %64 : vector<16x16xf32>
    %cst_29 = arith.constant dense<0.000000e+00> : vector<16x16xf32>
    %66 = tpu.matmul %65, %51, %cst_29 {dimension_numbers = #tpu.dot_dimension_numbers<[1], [0], [0], [1], [0, 0, 1, 1], [], []>} : vector<16x16xf32>, vector<16x16xf32>, vector<16x16xf32> -> vector<16x16xf32>
    %67 = vector.extract_strided_slice %6 {offsets = [0, 48], sizes = [16, 16], strides = [1, 1]} : vector<16x128xf32> to vector<16x16xf32>
    %68 = vector.extract_strided_slice %8 {offsets = [0, 48], sizes = [16, 16], strides = [1, 1]} : vector<16x128xf32> to vector<16x16xf32>
    %69 = vector.extract_strided_slice %10 {offsets = [0, 48], sizes = [16, 16], strides = [1, 1]} : vector<16x128xf32> to vector<16x16xf32>
    %cst_30 = arith.constant dense<0.000000e+00> : vector<16x16xf32>
    %70 = tpu.matmul %67, %68, %cst_30 {dimension_numbers = #tpu.dot_dimension_numbers<[1], [1], [0], [0], [0, 0, 1, 0], [], []>} : vector<16x16xf32>, vector<16x16xf32>, vector<16x16xf32> -> vector<16x16xf32>
    %cst_31 = arith.constant dense<0xFF800000> : vector<16xf32>
    %71 = vector.multi_reduction <maximumf>, %70, %cst_31 [1] : vector<16x16xf32> to vector<16xf32>
    %72 = vector.shape_cast %71 : vector<16xf32> to vector<16x1xf32>
    %73 = vector.broadcast %72 : vector<16x1xf32> to vector<16x16xf32>
    %74 = arith.subf %70, %73 : vector<16x16xf32>
    %75 = math.exp %74 : vector<16x16xf32>
    %cst_32 = arith.constant dense<0.000000e+00> : vector<16xf32>
    %76 = vector.multi_reduction <add>, %75, %cst_32 [1] : vector<16x16xf32> to vector<16xf32>
    %77 = vector.shape_cast %76 : vector<16xf32> to vector<16x1xf32>
    %cst_33 = arith.constant 1.000000e+00 : f32
    %78 = vector.broadcast %cst_33 : f32 to vector<16x1xf32>
    %79 = arith.divf %78, %77 : vector<16x1xf32>
    %80 = vector.broadcast %79 : vector<16x1xf32> to vector<16x16xf32>
    %81 = arith.mulf %75, %80 : vector<16x16xf32>
    %82 = vector.extract_strided_slice %12 {offsets = [0, 48], sizes = [16, 16], strides = [1, 1]} : vector<16x128xf32> to vector<16x16xf32>
    %83 = arith.mulf %81, %82 : vector<16x16xf32>
    %cst_34 = arith.constant dense<0.000000e+00> : vector<16x16xf32>
    %84 = tpu.matmul %83, %69, %cst_34 {dimension_numbers = #tpu.dot_dimension_numbers<[1], [0], [0], [1], [0, 0, 1, 1], [], []>} : vector<16x16xf32>, vector<16x16xf32>, vector<16x16xf32> -> vector<16x16xf32>
    %85 = vector.extract_strided_slice %6 {offsets = [0, 64], sizes = [16, 16], strides = [1, 1]} : vector<16x128xf32> to vector<16x16xf32>
    %86 = vector.extract_strided_slice %8 {offsets = [0, 64], sizes = [16, 16], strides = [1, 1]} : vector<16x128xf32> to vector<16x16xf32>
    %87 = vector.extract_strided_slice %10 {offsets = [0, 64], sizes = [16, 16], strides = [1, 1]} : vector<16x128xf32> to vector<16x16xf32>
    %cst_35 = arith.constant dense<0.000000e+00> : vector<16x16xf32>
    %88 = tpu.matmul %85, %86, %cst_35 {dimension_numbers = #tpu.dot_dimension_numbers<[1], [1], [0], [0], [0, 0, 1, 0], [], []>} : vector<16x16xf32>, vector<16x16xf32>, vector<16x16xf32> -> vector<16x16xf32>
    %cst_36 = arith.constant dense<0xFF800000> : vector<16xf32>
    %89 = vector.multi_reduction <maximumf>, %88, %cst_36 [1] : vector<16x16xf32> to vector<16xf32>
    %90 = vector.shape_cast %89 : vector<16xf32> to vector<16x1xf32>
    %91 = vector.broadcast %90 : vector<16x1xf32> to vector<16x16xf32>
    %92 = arith.subf %88, %91 : vector<16x16xf32>
    %93 = math.exp %92 : vector<16x16xf32>
    %cst_37 = arith.constant dense<0.000000e+00> : vector<16xf32>
    %94 = vector.multi_reduction <add>, %93, %cst_37 [1] : vector<16x16xf32> to vector<16xf32>
    %95 = vector.shape_cast %94 : vector<16xf32> to vector<16x1xf32>
    %cst_38 = arith.constant 1.000000e+00 : f32
    %96 = vector.broadcast %cst_38 : f32 to vector<16x1xf32>
    %97 = arith.divf %96, %95 : vector<16x1xf32>
    %98 = vector.broadcast %97 : vector<16x1xf32> to vector<16x16xf32>
    %99 = arith.mulf %93, %98 : vector<16x16xf32>
    %100 = vector.extract_strided_slice %12 {offsets = [0, 64], sizes = [16, 16], strides = [1, 1]} : vector<16x128xf32> to vector<16x16xf32>
    %101 = arith.mulf %99, %100 : vector<16x16xf32>
    %cst_39 = arith.constant dense<0.000000e+00> : vector<16x16xf32>
    %102 = tpu.matmul %101, %87, %cst_39 {dimension_numbers = #tpu.dot_dimension_numbers<[1], [0], [0], [1], [0, 0, 1, 1], [], []>} : vector<16x16xf32>, vector<16x16xf32>, vector<16x16xf32> -> vector<16x16xf32>
    %103 = vector.extract_strided_slice %6 {offsets = [0, 80], sizes = [16, 16], strides = [1, 1]} : vector<16x128xf32> to vector<16x16xf32>
    %104 = vector.extract_strided_slice %8 {offsets = [0, 80], sizes = [16, 16], strides = [1, 1]} : vector<16x128xf32> to vector<16x16xf32>
    %105 = vector.extract_strided_slice %10 {offsets = [0, 80], sizes = [16, 16], strides = [1, 1]} : vector<16x128xf32> to vector<16x16xf32>
    %cst_40 = arith.constant dense<0.000000e+00> : vector<16x16xf32>
    %106 = tpu.matmul %103, %104, %cst_40 {dimension_numbers = #tpu.dot_dimension_numbers<[1], [1], [0], [0], [0, 0, 1, 0], [], []>} : vector<16x16xf32>, vector<16x16xf32>, vector<16x16xf32> -> vector<16x16xf32>
    %cst_41 = arith.constant dense<0xFF800000> : vector<16xf32>
    %107 = vector.multi_reduction <maximumf>, %106, %cst_41 [1] : vector<16x16xf32> to vector<16xf32>
    %108 = vector.shape_cast %107 : vector<16xf32> to vector<16x1xf32>
    %109 = vector.broadcast %108 : vector<16x1xf32> to vector<16x16xf32>
    %110 = arith.subf %106, %109 : vector<16x16xf32>
    %111 = math.exp %110 : vector<16x16xf32>
    %cst_42 = arith.constant dense<0.000000e+00> : vector<16xf32>
    %112 = vector.multi_reduction <add>, %111, %cst_42 [1] : vector<16x16xf32> to vector<16xf32>
    %113 = vector.shape_cast %112 : vector<16xf32> to vector<16x1xf32>
    %cst_43 = arith.constant 1.000000e+00 : f32
    %114 = vector.broadcast %cst_43 : f32 to vector<16x1xf32>
    %115 = arith.divf %114, %113 : vector<16x1xf32>
    %116 = vector.broadcast %115 : vector<16x1xf32> to vector<16x16xf32>
    %117 = arith.mulf %111, %116 : vector<16x16xf32>
    %118 = vector.extract_strided_slice %12 {offsets = [0, 80], sizes = [16, 16], strides = [1, 1]} : vector<16x128xf32> to vector<16x16xf32>
    %119 = arith.mulf %117, %118 : vector<16x16xf32>
    %cst_44 = arith.constant dense<0.000000e+00> : vector<16x16xf32>
    %120 = tpu.matmul %119, %105, %cst_44 {dimension_numbers = #tpu.dot_dimension_numbers<[1], [0], [0], [1], [0, 0, 1, 1], [], []>} : vector<16x16xf32>, vector<16x16xf32>, vector<16x16xf32> -> vector<16x16xf32>
    %121 = vector.extract_strided_slice %6 {offsets = [0, 96], sizes = [16, 16], strides = [1, 1]} : vector<16x128xf32> to vector<16x16xf32>
    %122 = vector.extract_strided_slice %8 {offsets = [0, 96], sizes = [16, 16], strides = [1, 1]} : vector<16x128xf32> to vector<16x16xf32>
    %123 = vector.extract_strided_slice %10 {offsets = [0, 96], sizes = [16, 16], strides = [1, 1]} : vector<16x128xf32> to vector<16x16xf32>
    %cst_45 = arith.constant dense<0.000000e+00> : vector<16x16xf32>
    %124 = tpu.matmul %121, %122, %cst_45 {dimension_numbers = #tpu.dot_dimension_numbers<[1], [1], [0], [0], [0, 0, 1, 0], [], []>} : vector<16x16xf32>, vector<16x16xf32>, vector<16x16xf32> -> vector<16x16xf32>
    %cst_46 = arith.constant dense<0xFF800000> : vector<16xf32>
    %125 = vector.multi_reduction <maximumf>, %124, %cst_46 [1] : vector<16x16xf32> to vector<16xf32>
    %126 = vector.shape_cast %125 : vector<16xf32> to vector<16x1xf32>
    %127 = vector.broadcast %126 : vector<16x1xf32> to vector<16x16xf32>
    %128 = arith.subf %124, %127 : vector<16x16xf32>
    %129 = math.exp %128 : vector<16x16xf32>
    %cst_47 = arith.constant dense<0.000000e+00> : vector<16xf32>
    %130 = vector.multi_reduction <add>, %129, %cst_47 [1] : vector<16x16xf32> to vector<16xf32>
    %131 = vector.shape_cast %130 : vector<16xf32> to vector<16x1xf32>
    %cst_48 = arith.constant 1.000000e+00 : f32
    %132 = vector.broadcast %cst_48 : f32 to vector<16x1xf32>
    %133 = arith.divf %132, %131 : vector<16x1xf32>
    %134 = vector.broadcast %133 : vector<16x1xf32> to vector<16x16xf32>
    %135 = arith.mulf %129, %134 : vector<16x16xf32>
    %136 = vector.extract_strided_slice %12 {offsets = [0, 96], sizes = [16, 16], strides = [1, 1]} : vector<16x128xf32> to vector<16x16xf32>
    %137 = arith.mulf %135, %136 : vector<16x16xf32>
    %cst_49 = arith.constant dense<0.000000e+00> : vector<16x16xf32>
    %138 = tpu.matmul %137, %123, %cst_49 {dimension_numbers = #tpu.dot_dimension_numbers<[1], [0], [0], [1], [0, 0, 1, 1], [], []>} : vector<16x16xf32>, vector<16x16xf32>, vector<16x16xf32> -> vector<16x16xf32>
    %139 = vector.extract_strided_slice %6 {offsets = [0, 112], sizes = [16, 16], strides = [1, 1]} : vector<16x128xf32> to vector<16x16xf32>
    %140 = vector.extract_strided_slice %8 {offsets = [0, 112], sizes = [16, 16], strides = [1, 1]} : vector<16x128xf32> to vector<16x16xf32>
    %141 = vector.extract_strided_slice %10 {offsets = [0, 112], sizes = [16, 16], strides = [1, 1]} : vector<16x128xf32> to vector<16x16xf32>
    %cst_50 = arith.constant dense<0.000000e+00> : vector<16x16xf32>
    %142 = tpu.matmul %139, %140, %cst_50 {dimension_numbers = #tpu.dot_dimension_numbers<[1], [1], [0], [0], [0, 0, 1, 0], [], []>} : vector<16x16xf32>, vector<16x16xf32>, vector<16x16xf32> -> vector<16x16xf32>
    %cst_51 = arith.constant dense<0xFF800000> : vector<16xf32>
    %143 = vector.multi_reduction <maximumf>, %142, %cst_51 [1] : vector<16x16xf32> to vector<16xf32>
    %144 = vector.shape_cast %143 : vector<16xf32> to vector<16x1xf32>
    %145 = vector.broadcast %144 : vector<16x1xf32> to vector<16x16xf32>
    %146 = arith.subf %142, %145 : vector<16x16xf32>
    %147 = math.exp %146 : vector<16x16xf32>
    %cst_52 = arith.constant dense<0.000000e+00> : vector<16xf32>
    %148 = vector.multi_reduction <add>, %147, %cst_52 [1] : vector<16x16xf32> to vector<16xf32>
    %149 = vector.shape_cast %148 : vector<16xf32> to vector<16x1xf32>
    %cst_53 = arith.constant 1.000000e+00 : f32
    %150 = vector.broadcast %cst_53 : f32 to vector<16x1xf32>
    %151 = arith.divf %150, %149 : vector<16x1xf32>
    %152 = vector.broadcast %151 : vector<16x1xf32> to vector<16x16xf32>
    %153 = arith.mulf %147, %152 : vector<16x16xf32>
    %154 = vector.extract_strided_slice %12 {offsets = [0, 112], sizes = [16, 16], strides = [1, 1]} : vector<16x128xf32> to vector<16x16xf32>
    %155 = arith.mulf %153, %154 : vector<16x16xf32>
    %cst_54 = arith.constant dense<0.000000e+00> : vector<16x16xf32>
    %156 = tpu.matmul %155, %141, %cst_54 {dimension_numbers = #tpu.dot_dimension_numbers<[1], [0], [0], [1], [0, 0, 1, 1], [], []>} : vector<16x16xf32>, vector<16x16xf32>, vector<16x16xf32> -> vector<16x16xf32>
    %157 = tpu.concatenate %30, %48, %66, %84, %102, %120, %138, %156 in 1 : vector<16x16xf32>, vector<16x16xf32>, vector<16x16xf32>, vector<16x16xf32>, vector<16x16xf32>, vector<16x16xf32>, vector<16x16xf32>, vector<16x16xf32> -> vector<16x128xf32>
    %c0_55 = arith.constant 0 : index
    %c0_56 = arith.constant 0 : index
    %c0_57 = arith.constant 0 : index
    %158 = vector.load %arg7[%c0_55, %c0_56, %c0_57] : memref<1x16x128xf32, #tpu.memory_space<vmem>>, vector<1x16x128xf32>
    %159 = vector.shape_cast %158 : vector<1x16x128xf32> to vector<16x128xf32>
    %160 = vector.shape_cast %157 : vector<16x128xf32> to vector<1x16x128xf32>
    tpu.vector_store %arg7[%c0_55, %c0_56, %c0_57], %160 {strides = array<i32>} : memref<1x16x128xf32, #tpu.memory_space<vmem>>, vector<1x16x128xf32>,
    return
  }
  func.func @transform_0(%arg0: i32) -> (i32, i32, i32) {
    %c0_i32 = arith.constant 0 : i32
    %c0_i32_0 = arith.constant 0 : i32
    %c0_i32_1 = arith.constant 0 : i32
    return %arg0, %c0_i32, %c0_i32_0 : i32, i32, i32
  }
  func.func @transform_1(%arg0: i32) -> (i32, i32, i32) {
    %c0_i32 = arith.constant 0 : i32
    %c0_i32_0 = arith.constant 0 : i32
    %c0_i32_1 = arith.constant 0 : i32
    return %arg0, %c0_i32, %c0_i32_0 : i32, i32, i32
  }
  func.func @transform_2(%arg0: i32) -> (i32, i32, i32) {
    %c0_i32 = arith.constant 0 : i32
    %c0_i32_0 = arith.constant 0 : i32
    %c0_i32_1 = arith.constant 0 : i32
    return %arg0, %c0_i32, %c0_i32_0 : i32, i32, i32
  }
  func.func @transform_3(%arg0: i32) -> (i32, i32) {
    %c0_i32 = arith.constant 0 : i32
    %c0_i32_0 = arith.constant 0 : i32
    %c0_i32_1 = arith.constant 0 : i32
    return %c0_i32, %c0_i32_0 : i32, i32
  }
  func.func @transform_4(%arg0: i32) -> (i32, i32) {
    %c0_i32 = arith.constant 0 : i32
    %c0_i32_0 = arith.constant 0 : i32
    %c0_i32_1 = arith.constant 0 : i32
    return %c0_i32, %c0_i32_0 : i32, i32
  }
  func.func @transform_5(%arg0: i32) -> (i32, i32, i32) {
    %c0_i32 = arith.constant 0 : i32
    %c0_i32_0 = arith.constant 0 : i32
    %c0_i32_1 = arith.constant 0 : i32
    return %arg0, %c0_i32, %c0_i32_0 : i32, i32, i32
  }
  func.func @transform_6(%arg0: i32) -> (i32, i32, i32) {
    %c0_i32 = arith.constant 0 : i32
    %c0_i32_0 = arith.constant 0 : i32
    %c0_i32_1 = arith.constant 0 : i32
    return %arg0, %c0_i32, %c0_i32_0 : i32, i32, i32
  }
}

</mosaic_0001>

<bundles_post_ra>
// kernel: tpu_custom_call.1
= control target key start
LH: loop header
LB: loop body
LE: loop exit
PB: predicated region body
PF: predicated region fallthrough
CT: control target
= control target key end

     0   :  { %s3949_s0 = inlined_call_operand.hbm [shape: f32[2,16,128], index: 0, kind: input, shape index: {}]   ;;  %s3950_s1 = inlined_call_operand.hbm [shape: f32[2,16,128], index: 1, kind: input, shape index: {}]   ;;  %s3951_s2 = inlined_call_operand.hbm [shape: f32[2,16,128], index: 2, kind: input, shape index: {}]   ;;  %s3952_s3 = inlined_call_operand.hbm [shape: f32[128,128], index: 3, kind: input, shape index: {}]   ;;  %s3953_s4 = inlined_call_operand.vmem [shape: f32[1,128], index: 4, kind: input, shape index: {}]   ;;  %s3954_s5 = inlined_call_operand.hbm [shape: f32[2,16,128], index: 5, kind: input, shape index: {}]   ;;  %s3955_s6 = inlined_call_operand.hbm [shape: f32[2,16,128], index: 6, kind: output, shape index: {}]  }
   0x1   :  { %3975 = sst [smem:[#allocation23_spill]] %s3949_s0 }
   0x2   :  { %3976 = sst [smem:[#allocation24_spill]] %s3950_s1 }
   0x3   :  { %3977 = sst [smem:[#allocation25_spill]] %s3951_s2 }
   0x4   :  { %11 = vsyncpa [#allocation3], 0 }
   0x5   :  { %13 = vsyncpa [#allocation3 + $0x1], 0 }
   0x6   :  { %14 = vsyncpa [#allocation6], 0 }
   0x7   :  { %16 = vsyncpa [#allocation6 + $0x1], 0 }
   0x8   :  { %17 = vsyncpa [#allocation9], 0 }
   0x9   :  { %18 = vsyncpa [#allocation4], 0 }
   0xa   :  { %20 = vsyncpa [#allocation4 + $0x1], 0  ;;  %s3332_s21 = smov 0   ;;  %s3334_s22 = smov 0  }
   0xb   :  { %s3336_s23 = smov 0   ;;  %s3338_s24 = smov 0  }
   0xc LB: > { %3978 = sst [smem:[#allocation17_spill]] %s3266_s21  ;;  %s3353_s25 = sadd.s32 1, %s3278_s24   ;;  %s3278_s24 = sphi %s3338_s24, %s4012_s24   ;;  %s3274_s23 = sphi %s3336_s23, %s4014_s23   ;;  %s3270_s22 = sphi %s3334_s22, %s4016_s22   ;;  %s3266_s21 = sphi %s3332_s21, %s4015_s21  }
   0xd   : > { %3979 = sst [smem:[#allocation18_spill]] %s3274_s23  ;;  %s33_s26 = sadd.s32 1, %s3274_s23 }
   0xe   : > { %3980 = sst [smem:[#allocation19_spill]] %s3278_s24  ;;  %s30_s27 = ssub.s32 %s3278_s24, %s3353_s25 }
   0xf   : > { %3981 = sst [smem:[#allocation20_spill]] %s3353_s25  ;;  %p3956_p0 = scmp.ne.s32.totalorder %s3274_s23, %s3270_s22 }
  0x10   : > { %p31_p1 = scmp.eq.s32.totalorder %s30_s27, 0  ;;  %p41_p2 = scmp.eq.s32.totalorder %s3278_s24, 0 }
  0x11   : > { %p2871_p5 = scmp.lt.s32.totalorder %s3278_s24, 2  ;;  %s232_s29 = sand.u32 1, %s3278_s24  }
  0x12   : > { %s3362_s28 = scalar_select %p31_p1, %s3274_s23, %s33_s26  }
  0x13   : > { %p42_p3 = por %p41_p2, %p3956_p0  ;;  %s234_s30 = sand.u32 1, %s3274_s23  }
  0x14   : > { %3982 = sst [smem:[#allocation21_spill]] %s3362_s28  ;;  %s3371_s7 = sshll.u32 %s234_s30, 4 }
  0x15   : > { %s3374_s8 = sshll.u32 %s3278_s24, 8  ;;  %s3983_s0 = sld [smem:[#allocation23_spill]] }
  0x16   : > { %s236_s12 = scalar_lea.vmem [#allocation2], %s3371_s7  ;;  %p3383_p6 = pnand %p2871_p5, %p42_p3 }
  0x17   : > { %s243_s13 = sshll.u32 %s236_s12, 4  ;;  %s3391_s15 = scalar_lea.sflag [#allocation3], %s232_s29  ;;  %s3387_s13 = int_to_ptr.vmem [resolvable:$true] %s243_s13 }
  0x18   : > { %s3984_s14 = scalar_select %p3383_p6, 1, 0 }
  0x19   : > { %p3397_p8 = pneg %p3383_p6 }
  0x1b   : > { %s3380_s11 = scalar_lea.hbm %s3983_s0, %s3374_s8  ;;  %s3057_s20 = scalar_lea.hbm %s3983_s0, 512 }
  0x1c   : > { %s3052_s16 = scalar_lea.hbm %s3380_s11, 256  ;;  %p3058_p11 = scmp.lt.u32.totalorder %s3380_s11, %s3983_s0 }
  0x1d   : > { %p3053_p7 = scmp.ne.s32.totalorder %s3380_s11, %s3052_s16  ;;  %p3059_p12 = scmp.lt.u32.totalorder %s3057_s20, %s3052_s16 }
  0x1e   : > { %s3985_s17 = scalar_select %p3397_p8, 1, 0 }
  0x1f   : > { %p3055_p9 = pnand %p3397_p8, %p3053_p7  ;;  %p3060_p13 = por %p3059_p12, %p3058_p11 }
  0x20   : > { %p3061_p1 = scmp.lt.u32.totalorder %s3052_s16, %s3380_s11 }
  0x21   : > { %p3056_p10 = pneg %p3055_p9 }
  0x22   : > { %p3062_p2 = por %p3061_p1, %p3060_p13 }
  0x24   : > { %p3063_p3 = pnand %p3062_p2, %p3056_p10 }
  0x26   : > { %3066 = shalt.err (!%p3063_p3)
}
  0x27   : > { %s3067_s30 = scalar_lea.vmem %s3387_s13, 256  ;;  %s3280_s9 = smov [#allocation2]  }
  0x28   : > { %p3068_p5 = scmp.ne.s32.totalorder %s3387_s13, %s3067_s30  ;;  %s3072_s10 = sshll.u32 %s3280_s9, 4  ;;  %s3073_s10 = int_to_ptr.vmem [resolvable:$false] %s3072_s10 }
  0x29   : > { %s3074_s12 = scalar_lea.vmem %s3073_s10, 512  ;;  %p3075_p4 = scmp.lt.s32.totalorder %s3387_s13, %s3073_s10 }
  0x2a   : > { %p3070_p7 = pnand %p3068_p5, %p3397_p8  ;;  %p3076_p0 = scmp.lt.s32.totalorder %s3074_s12, %s3067_s30 }
  0x2c   : > { %p3071_p9 = pneg %p3070_p7  ;;  %p3077_p11 = por %p3076_p0, %p3075_p4 }
  0x2e   : > { %p3078_p12 = pnand %p3077_p11, %p3071_p9 }
  0x30   : > { %3081 = shalt.err (!%p3078_p12)
}
  0x31   : > { %s3957_s16 = smov 128   ;;  %s3959_s18 = smov 8  }
  0x32   : > { %2856 = dma.hbm_to_vmem [thread:$0]  (!%p3383_p6), %s3380_s11, 256, %s3387_s13, %s3391_s15, %s3957_s16, %s3957_s16, %s3959_s18  }
  0x33   : > { %s3986_s1 = sld [smem:[#allocation24_spill]]  ;;  %s257_s27 = scalar_lea.vmem [#allocation5], %s3371_s7 }
  0x34   : > { %s264_s30 = sshll.u32 %s257_s27, 4  ;;  %s3435_s9 = scalar_lea.sflag [#allocation6], %s232_s29  ;;  %s3431_s30 = int_to_ptr.vmem [resolvable:$true] %s264_s30 }
  0x39   : > { %s3428_s26 = scalar_lea.hbm %s3986_s1, %s3374_s8  ;;  %s3087_s12 = scalar_lea.hbm %s3986_s1, 512 }
  0x3a   : > { %s3082_s10 = scalar_lea.hbm %s3428_s26, 256  ;;  %p3088_p13 = scmp.lt.u32.totalorder %s3428_s26, %s3986_s1 }
  0x3b   : > { %p3083_p0 = scmp.ne.s32.totalorder %s3428_s26, %s3082_s10  ;;  %p3089_p1 = scmp.lt.u32.totalorder %s3087_s12, %s3082_s10 }
  0x3c   : > { %p3091_p3 = scmp.lt.u32.totalorder %s3082_s10, %s3428_s26 }
  0x3d   : > { %p3085_p4 = pnand %p3083_p0, %p3397_p8  ;;  %p3090_p2 = por %p3089_p1, %p3088_p13 }
  0x3f   : > { %p3086_p10 = pneg %p3085_p4  ;;  %p3092_p5 = por %p3091_p3, %p3090_p2 }
  0x41   : > { %p3093_p7 = pnand %p3092_p5, %p3086_p10 }
  0x43   : > { %3096 = shalt.err (!%p3093_p7)
}
  0x44   : > { %s3097_s29 = scalar_lea.vmem %s3431_s30, 256  ;;  %s3283_s27 = smov [#allocation5]  }
  0x45   : > { %p3098_p9 = scmp.ne.s32.totalorder %s3431_s30, %s3097_s29  ;;  %s3102_s11 = sshll.u32 %s3283_s27, 4  ;;  %s3103_s11 = int_to_ptr.vmem [resolvable:$false] %s3102_s11 }
  0x46   : > { %s3104_s13 = scalar_lea.vmem %s3103_s11, 512  ;;  %p3105_p0 = scmp.lt.s32.totalorder %s3431_s30, %s3103_s11 }
  0x47   : > { %p3100_p11 = pnand %p3098_p9, %p3397_p8  ;;  %p3106_p4 = scmp.lt.s32.totalorder %s3104_s13, %s3097_s29 }
  0x49   : > { %p3101_p12 = pneg %p3100_p11  ;;  %p3107_p13 = por %p3106_p4, %p3105_p0 }
  0x4b   : > { %p3108_p1 = pnand %p3107_p13, %p3101_p12 }
  0x4d   : > { %3111 = shalt.err (!%p3108_p1)
}
  0x4e   : > { %2859 = dma.hbm_to_vmem [thread:$0]  (!%p3383_p6), %s3428_s26, 256, %s3431_s30, %s3435_s9, %s3957_s16, %s3957_s16, %s3959_s18  }
  0x4f   : > { %s3463_s10 = sadd.s32 4294967295, %s3278_s24   ;;  %s2412_s12 = sadd.s32 4294967294, %s3278_s24  }
  0x50   : > { %p46_p10 = scmp.ne.s32.totalorder %s3270_s22, %s3266_s21  ;;  %p3962_p2 = scmp.eq.s32.totalorder %s3463_s10, 0 }
  0x51   : > { %p190_p3 = scmp.eq.s32.totalorder %s3463_s10, 1  ;;  %p196_p5 = scmp.eq.s32.totalorder %s2412_s12, 1 }
  0x52   : > { %p2413_p7 = scmp.ge.s32.totalorder %s3278_s24, 1  ;;  %p3473_p9 = por %p3962_p2, %p46_p10 }
  0x53   : > { %p3988_p11 = scmp.ne.s32.totalorder %s3274_s23, %s3270_s22  ;;  %p3484_p0 = por %p196_p5, %p46_p10 }
  0x54   : > { %s3987_s19 = scalar_select %p3473_p9, 1, 0 }
  0x55   : > { %p3480_p12 = por %p190_p3, %p3988_p11  ;;  %p203_p4 = scmp.lt.s32.totalorder %s3278_s24, 3 }
  0x56   : > { %s3990_s30 = scalar_select %p3484_p0, 1, 0 }
  0x57   : > { %s3989_s26 = scalar_select %p3480_p12, 1, 0 }
  0x58   : > { %3991 = sst [smem:[#allocation22_spill]] %s3990_s30  ;;  %p3489_p13 = pnand %p2413_p7, %p203_p4 }
  0x59   : > { %s3284_s29 = smov [#allocation8]   ;;  %s3993_s2 = sld [smem:[#allocation25_spill]] }
  0x5a   : > { %s3992_s20 = scalar_select %p3489_p13, 1, 0 }
  0x5b   : > { %s215_s27 = sshll.u32 %s3284_s29, 4  ;;  %p2849_p1 = pneg %p3489_p13  ;;  %s3493_s27 = int_to_ptr.vmem [resolvable:$true] %s215_s27 }
  0x5c   : > { %s278_s16 = scalar_lea.vmem [#allocation7], %s3371_s7 }
  0x5d   : > { %s285_s18 = sshll.u32 %s278_s16, 4  ;;  %p3506_p10 = pnand %p2849_p1, %p3962_p2  ;;  %s3510_s18 = int_to_ptr.vmem [resolvable:$true] %s285_s18 }
  0x5f   : > { %s3501_s12 = scalar_lea.hbm %s3993_s2, %s3374_s8  ;;  %s3117_s1 = scalar_lea.hbm %s3993_s2, 512 }
  0x60   : > { %s3994_s0 = scalar_select %p3506_p10, 1, 0 }
  0x61   : > { %s3112_s29 = scalar_lea.hbm %s3501_s12, 256  ;;  %p3118_p11 = scmp.lt.u32.totalorder %s3501_s12, %s3993_s2 }
  0x62   : > { %p3113_p3 = scmp.ne.s32.totalorder %s3501_s12, %s3112_s29  ;;  %p3119_p4 = scmp.lt.u32.totalorder %s3117_s1, %s3112_s29 }
  0x63   : > { %p3121_p2 = scmp.lt.u32.totalorder %s3112_s29, %s3501_s12 }
  0x64   : > { %p3115_p5 = pnand %p3113_p3, %p3397_p8  ;;  %p3120_p1 = por %p3119_p4, %p3118_p11 }
  0x66   : > { %p3116_p7 = pneg %p3115_p5  ;;  %p3122_p0 = por %p3121_p2, %p3120_p1 }
  0x68   : > { %p3123_p12 = pnand %p3122_p0, %p3116_p7 }
  0x6a   : > { %3126 = shalt.err (!%p3123_p12)
}
  0x6b   : > { %s3127_s16 = scalar_lea.vmem %s3510_s18, 256  ;;  %s3285_s11 = smov [#allocation7]  }
  0x6c   : > { %p3128_p3 = scmp.ne.s32.totalorder %s3510_s18, %s3127_s16  ;;  %s3132_s13 = sshll.u32 %s3285_s11, 4  ;;  %s3133_s13 = int_to_ptr.vmem [resolvable:$false] %s3132_s13 }
  0x6d   : > { %s3134_s23 = scalar_lea.vmem %s3133_s13, 512  ;;  %p3135_p13 = scmp.lt.s32.totalorder %s3510_s18, %s3133_s13 }
  0x6e   : > { %p3130_p5 = pnand %p3128_p3, %p3397_p8  ;;  %p3136_p10 = scmp.lt.s32.totalorder %s3134_s23, %s3127_s16 }
  0x70   : > { %p3131_p9 = pneg %p3130_p5  ;;  %p3137_p11 = por %p3136_p10, %p3135_p13 }
  0x72   : > { %p3138_p4 = pnand %p3137_p11, %p3131_p9 }
  0x74   : > { %3141 = shalt.err (!%p3138_p4)
}
  0x75   : > { %s3995_s1 = smov 8   ;;  %s3996_s28 = smov 128  }
  0x76   : > { %2862 = dma.hbm_to_vmem [thread:$0]  (!%p3383_p6), %s3501_s12, 256, %s3510_s18, %s3435_s9, %s3996_s28, %s3996_s28, %s3995_s1  }
  0x77   : > { %s3541_s2 = scalar_lea.hbm %s3954_s5, %s3374_s8  ;;  %s3142_s23 = scalar_lea.hbm %s3952_s3, 2048 }
  0x78   : > { %p3143_p2 = scmp.ne.s32.totalorder %s3952_s3, %s3142_s23  ;;  %p3997_p9 = scmp.ne.s32.totalorder %s3994_s0, 0 }
  0x79   : > { %p3149_p10 = scmp.lt.u32.totalorder %s3142_s23, %s3952_s3 }
  0x7a   : > { %p3144_p12 = pneg %p3997_p9 }
  0x7c   : > { %p3145_p0 = pnand %p3144_p12, %p3143_p2 }
  0x7e   : > { %p3146_p13 = pneg %p3145_p0 }
  0x80   : > { %p3151_p7 = pnand %p3149_p10, %p3146_p13 }
  0x82   : > { %3154 = shalt.err (!%p3151_p7)
}
  0x83   : > { %s3155_s8 = scalar_lea.vmem %s3493_s27, 2048  ;;  %p3163_p11 = scmp.lt.s32.totalorder %s3493_s27, %s3493_s27 }
  0x84   : > { %p3156_p1 = scmp.ne.s32.totalorder %s3493_s27, %s3155_s8  ;;  %p3164_p4 = scmp.lt.s32.totalorder %s3155_s8, %s3155_s8 }
  0x86   : > { %p3158_p3 = pnand %p3156_p1, %p3144_p12  ;;  %p3165_p6 = por %p3164_p4, %p3163_p11 }
  0x88   : > { %p3159_p5 = pneg %p3158_p3 }
  0x8a   : > { %p3166_p8 = pnand %p3165_p6, %p3159_p5 }
  0x8c   : > { %3169 = shalt.err (!%p3166_p8)
}
  0x8d   : > { %2852 = dma.hbm_to_vmem [thread:$0]  (!%p3997_p9), %s3952_s3, 2048, %s3493_s27, [#allocation9], %s3996_s28, %s3996_s28, %s3995_s1  }
  0x8e   : > { %s299_s25 = scalar_lea.vmem [#allocation10], %s3371_s7  ;;  %s3170_s9 = scalar_lea.hbm %s3541_s2, 256 }
  0x8f   : > { %s306_s18 = sshll.u32 %s299_s25, 4  ;;  %p3171_p6 = scmp.ne.s32.totalorder %s3541_s2, %s3170_s9  ;;  %s3568_s18 = int_to_ptr.vmem [resolvable:$true] %s306_s18 }
  0x90   : > { %p3998_p8 = scmp.ne.s32.totalorder %s3985_s17, 0  ;;  %s3175_s12 = scalar_lea.hbm %s3954_s5, 512 }
  0x91   : > { %p3176_p0 = scmp.lt.u32.totalorder %s3541_s2, %s3954_s5  ;;  %p3177_p13 = scmp.lt.u32.totalorder %s3175_s12, %s3170_s9 }
  0x92   : > { %p3173_p2 = pnand %p3171_p6, %p3998_p8  ;;  %p3179_p9 = scmp.lt.u32.totalorder %s3170_s9, %s3541_s2 }
  0x93   : > { %p3178_p10 = por %p3177_p13, %p3176_p0 }
  0x94   : > { %p3174_p12 = pneg %p3173_p2 }
  0x95   : > { %p3180_p7 = por %p3179_p9, %p3178_p10 }
  0x97   : > { %p3181_p1 = pnand %p3180_p7, %p3174_p12 }
  0x99   : > { %3184 = shalt.err (!%p3181_p1)
}
  0x9a   : > { %s3185_s7 = scalar_lea.vmem %s3568_s18, 256  ;;  %s3286_s27 = smov [#allocation10]  }
  0x9b   : > { %p3186_p3 = scmp.ne.s32.totalorder %s3568_s18, %s3185_s7  ;;  %s3190_s16 = sshll.u32 %s3286_s27, 4  ;;  %s3191_s16 = int_to_ptr.vmem [resolvable:$false] %s3190_s16 }
  0x9c   : > { %s3192_s13 = scalar_lea.vmem %s3191_s16, 512  ;;  %p3193_p4 = scmp.lt.s32.totalorder %s3568_s18, %s3191_s16 }
  0x9d   : > { %p3188_p5 = pnand %p3186_p3, %p3998_p8  ;;  %p3194_p6 = scmp.lt.s32.totalorder %s3192_s13, %s3185_s7 }
  0x9f   : > { %p3189_p11 = pneg %p3188_p5  ;;  %p3195_p2 = por %p3194_p6, %p3193_p4 }
  0xa1   : > { %p3196_p0 = pnand %p3195_p2, %p3189_p11 }
  0xa3   : > { %3199 = shalt.err (!%p3196_p0)
}
  0xa4   : > { %p3999_p12 = scmp.ne.s32.totalorder %s3984_s14, 0  ;;  %p4000_p8 = scmp.ne.s32.totalorder %s3992_s20, 0 }
  0xa5   : > { %s320_s17 = sand.u32 (!%p4000_p8), 1, %s3463_s10   ;;  %s322_s23 = sand.u32 (!%p4000_p8), 1, %s3270_s22  }
  0xa6   : > { %2865 = dma.hbm_to_vmem [thread:$0]  (!%p3999_p12), %s3541_s2, 256, %s3568_s18, %s3391_s15, %s3996_s28, %s3996_s28, %s3995_s1  }
  0xa7   : > { %318 = sbr.rel (%p4000_p8) target bundleno = 4612 (0x1204), region = 44  ;;  %s3601_s8 = sshll.u32 (!%p4000_p8), %s322_s23, 4 }
  0xa8   : > { %s321_s14 = scalar_lea.sflag (!%p4000_p8), [#allocation3], %s320_s17  ;;  %s324_s21 = scalar_lea.vmem (!%p4000_p8), [#allocation2], %s3601_s8 }
  0xa9   : > { %p4001_p13 = scmp.ne.s32.totalorder (!%p4000_p8), %s3987_s19, 0 }
  0xae   : > { %3245 = dma.done.wait (%p4001_p13), %s321_s14, 256  }
  0xaf   : > { %3247 = vsyncadd (%p4001_p13), %s321_s14, 4294967040  ;;  %s330_s2 = scalar_lea.sflag [#allocation6], %s320_s17  ;;  %s333_s15 = scalar_lea.vmem [#allocation5], %s3601_s8 }
  0xb0   : > { %3249 = dma.done.wait (%p4001_p13), %s330_s2, 512  }
  0xb1   : > { %3251 = vsyncadd (%p4001_p13), %s330_s2, 4294966784  ;;  %s342_s20 = scalar_lea.vmem [#allocation7], %s3601_s8  ;;  %p4002_p10 = scmp.eq.s32.totalorder %s3463_s10, 0 }
  0xb3   : > { %3253 = dma.done.wait (%p4002_p10), [#allocation9], 2048   ;;  %p4003_p9 = pmov %p4002_p10 }
  0xb4   : > { %s355_s1 = scalar_lea.vmem [#allocation10], %s3601_s8 }
  0xb5   : > { %3255 = vsyncadd (%p4003_p9), [#allocation9], 4294965248 }
  0xb6   : > { %3257 = dma.done.wait (%p4001_p13), %s321_s14, 256  }
  0xb7   : > { %3259 = vsyncadd (%p4001_p13), %s321_s14, 4294967040  ;;  %v401_v0 = vld [vmem:[#allocation8] sm:$0xff]  ;;  %v402_v1 = vld [vmem:[#allocation8 + $0x8] sm:$0xff]  ;;  %vm505_vm0 = vcmask 130048   ;;  %s3287_s24 = smov 112   ;;  %s3288_s25 = smov 96  }
  0xb8   : > { %v403_v2 = vld [vmem:[#allocation8 + $0x10] sm:$0xff]  ;;  %v2723_v3 = vpack.c.bf16 %v402_v1, %v401_v0  ;;  %v404_v4 = vld [vmem:[#allocation8 + $0x18] sm:$0xff]  ;;  %v405_v6 = vld [vmem:[#allocation8 + $0x20] sm:$0xff]  ;;  %s3289_s18 = smov 80   ;;  %s3290_s9 = smov 64   ;;  %vm2232_vm2 = vcmask 261120  }
  0xb9   : > { %v2727_v5 = vpack.c.bf16 %v404_v4, %v403_v2  ;;  %v406_v7 = vld [vmem:[#allocation8 + $0x28] sm:$0xff]  ;;  %v407_v9 = vld [vmem:[#allocation8 + $0x30] sm:$0xff]  ;;  %vm3627_vm1 = vmpackc.low %vm505_vm0, %vm505_vm0  ;;  %s3291_s0 = smov 48   ;;  %s3292_s30 = smov 32   ;;  %vm2235_vm3 = vcmask 392192   ;;  %vm2238_vm4 = vcmask 523264  }
  0xba   : > { %2724 = vmatprep.subr.bf16.mxu0 %v2723_v3  ;;  %v2731_v8 = vpack.c.bf16 %v406_v7, %v405_v6  ;;  %v399_v10 = vld [vmem:[%s324_s21] sm:$0xff]  ;;  %v408_v12 = vld [vmem:[#allocation8 + $0x38] sm:$0xff]  ;;  %v410_v18 = vld [vmem:[#allocation8 + $0x48] sm:$0xff]  ;;  %s3293_s12 = smov 16   ;;  %vm2241_vm5 = vcmask 654336   ;;  %s398_s29 = scalar_lea.vmem [#allocation11], %s3601_s8 }
  0xbb   : > { %2726 = vmatpush3.bf16.msra.mxu0 %v2723_v3  ;;  %2608 = vmatprep.mubr.f32.mxu0 %v399_v10  ;;  %v499_v13 = vld [vmem:[%s333_s15] sm:$0xff]  ;;  %v500_v14 = vld [vmem:[%s333_s15 + $0x8] sm:$0xff]  ;;  %v2735_v16 = vpack.c.bf16 %v408_v12, %v407_v9  ;;  %s2266_s11 = sshll.u32 %s398_s29, 4  ;;  %vm2244_vm6 = vcmask 785408   ;;  %s2493_s7 = sshll.u32 %s3463_s10, 8  ;;  %vm2247_vm7 = vcmask 916480   ;;  %s3897_s11 = int_to_ptr.vmem [resolvable:$true] %s2266_s11 }
  0xbc   : > { %2728 = vmatprep.subr.bf16.mxu0 %v2727_v5  ;;  %v2755_v15 = vpack.c.bf16 %v500_v14, %v499_v13  ;;  %v409_v17 = vld [vmem:[#allocation8 + $0x40] sm:$0xff]  ;;  %v411_v20 = vld [vmem:[#allocation8 + $0x50] sm:$0xff]  ;;  %v412_v21 = vld [vmem:[#allocation8 + $0x58] sm:$0xff]  ;;  %v3650_v39 = vpack.i.bf16 %v500_v14, %v499_v13  ;;  %s3903_s16 = scalar_lea.hbm %s3955_s6, %s2493_s7  ;;  %s3907_s13 = scalar_lea.sflag [#allocation4], %s322_s23 }
  0xbd   : > { %v2739_v19 = vpack.c.bf16 %v410_v18, %v409_v17  ;;  %v2743_v22 = vpack.c.bf16 %v412_v21, %v411_v20  ;;  %v413_v23 = vld [vmem:[#allocation8 + $0x60] sm:$0xff]  ;;  %v414_v24 = vld [vmem:[#allocation8 + $0x68] sm:$0xff]  ;;  %v415_v26 = vld [vmem:[#allocation8 + $0x70] sm:$0xff]  ;;  %s3200_s17 = scalar_lea.vmem %s3897_s11, 256  ;;  %p4006_p1 = scmp.ne.s32.totalorder %s3989_s26, 0 }
  0xbe   : > { %2757 = vmatprep.subr.msk.bf16.mxu1 %vm3627_vm1, %v2755_v15  ;;  %v2747_v25 = vpack.c.bf16 %v414_v24, %v413_v23  ;;  %v416_v27 = vld [vmem:[#allocation8 + $0x78] sm:$0xff]  ;;  %v2435_v30 = vld [vmem:[%s3953_s4] ss:$0 sm:$0xff]  ;;  %p3201_p7 = scmp.ne.s32.totalorder %s3897_s11, %s3200_s17  ;;  %s3294_s8 = smov [#allocation11]  }
  0xbf   : > { %2730 = vmatpush3.bf16.msra.mxu0 %v2727_v5  ;;  %2760 = vmatpush3.bf16.xpose.msk.msra.mxu1 %vm3627_vm1, %v2755_v15  ;;  %v2751_v28 = vpack.c.bf16 %v416_v27, %v415_v26  ;;  %v400_v29 = vld [vmem:[%s324_s21 + $0x8] sm:$0xff]  ;;  %v501_v50 = vld [vmem:[%s342_s20] sm:$0xff]  ;;  %s3204_s14 = sshll.u32 %s3294_s8, 4  ;;  %s3205_s14 = int_to_ptr.vmem [resolvable:$false] %s3204_s14 }
  0xc0   : > { %2732 = vmatprep.subr.bf16.mxu0 %v2731_v8  ;;  %v502_v51 = vld [vmem:[%s342_s20 + $0x8] sm:$0xff]  ;;  %v3668_v62 = vld [vmem:[%s355_s1] sm:$0xff]  ;;  %p3202_p3 = pnand %p3201_p7, %p4006_p1  ;;  %s3206_s21 = scalar_lea.vmem %s3205_s14, 512 }
  0xc1   : > { %v2761_v52 = vpack.c.bf16 %v502_v51, %v501_v50  ;;  %v3672_v0 = vld [vmem:[%s355_s1 + $0x8] sm:$0xff]  ;;  %v3688_v12 = vpack.i.bf16 %v502_v51, %v501_v50  ;;  %p3207_p11 = scmp.lt.s32.totalorder %s3897_s11, %s3205_s14  ;;  %p3208_p4 = scmp.lt.s32.totalorder %s3206_s21, %s3200_s17 }
  0xc2   : > { %p3203_p5 = pneg %p3202_p3 }
  0xc3   : > { %2734 = vmatpush3.bf16.msra.mxu0 %v2731_v8  ;;  %2762 = vmatprep.subr.bf16.mxu1 %v2761_v52  ;;  %p3209_p6 = por %p3208_p4, %p3207_p11 }
  0xc4   : > { %2736 = vmatprep.subr.bf16.mxu0 %v2735_v16 }
  0xc5   : > { %p3210_p2 = pnand %p3209_p6, %p3203_p5 }
  0xc7   : > { %2738 = vmatpush3.bf16.msra.mxu0 %v2735_v16 }
  0xc8   : > { %2740 = vmatprep.subr.bf16.mxu0 %v2739_v19 }
  0xcb   : > { %2742 = vmatpush3.bf16.msra.mxu0 %v2739_v19 }
  0xcc   : > { %2744 = vmatprep.subr.bf16.mxu0 %v2743_v22 }
  0xcf   : > { %2746 = vmatpush3.bf16.msra.mxu0 %v2743_v22 }
  0xd0   : > { %2748 = vmatprep.subr.bf16.mxu0 %v2747_v25 }
  0xd3   : > { %2750 = vmatpush3.bf16.msra.mxu0 %v2747_v25 }
  0xd4   : > { %2752 = vmatprep.subr.bf16.mxu0 %v2751_v28 }
  0xd7   : > { %2754 = vmatpush3.bf16.msra.mxu0 %v2751_v28 }
  0xda   : > { %2609 = vmatmul.mubr.f32.vlgmr.msra.gmra.mrb[0].mxu0 %v400_v29 }
 0x1ad   : > { %v2610_v31 = vpop.f32.mrb[0].mxu0 }
 0x1ae   : > { %v490_v32 = vpop.f32.mrb[1].mxu0  ;;  %v3642_v34 = vadd.f32 %v2610_v31, %v2435_v30 }
 0x1af   : > { %v3640_v33 = vadd.f32 %v2435_v30, %v490_v32 }
 0x1b1   : > { %2615 = vmatprep.mubr.msk.f32.mxu1 %vm505_vm0, %v3640_v33 }
 0x1b2   : > { %2616 = vmatmul.mubr.msk.f32.vlgmr.msra.gmra.mrb[0].mxu1 %vm505_vm0, %v3642_v34 }
 0x1b3   : > { %2764 = vmatpush3.bf16.msra.mxu1 %v2761_v52 }
 0x285   : > { %v2617_v35 = vpop.f32.mrb[0].mxu1 }
 0x286   : > { %v584_v36 = vpop.f32.mrb[1].mxu1  ;;  %v596_v38 = vsel %vm505_vm0, %v2617_v35, -inf }
 0x287   : > { %v593_v37 = vsel %vm505_vm0, %v584_v36, -inf }
 0x288   : > { %594 = vmax.xlane.f32.xlu0 %v593_v37 }
 0x28c   : > { %597 = vmax.xlane.f32.xlu0 %v596_v38 }
 0x2a2   : > { %2919 = vrot.lane.b32.xlu0 %v3650_v39, %s3287_s24 }
 0x315   : > { %v595_v40 = vpop.xlane.xlu0 %594 }
 0x316   : > { %v599_v41 = vsub.f32 %v584_v36, %v595_v40 }
 0x318   : > { %v601_v44 = vmul.f32 1.442695, %v599_v41 }
 0x319   : > { %v598_v42 = vpop.xlane.xlu0 %597 }
 0x31a   : > { %v600_v43 = vsub.f32 %v2617_v35, %v598_v42 }
 0x31c   : > { %v603_v45 = vmul.f32 1.442695, %v600_v43 }
 0x31d   : > { %v2920_v53 = vpop.permute.xlu0 %2919 }
 0x31e   : > { %2988 = vpow2.f32 %v603_v45  ;;  %v2922_v54 = vunpack.i.h.bf16 %v2920_v53  ;;  %v2921_v55 = vunpack.i.l.bf16 %v2920_v53 }
 0x31f   : > { %2990 = vpow2.f32 %v601_v44 }
 0x320   : > { %v2765_v56 = vpack.c.bf16 %v2922_v54, %v2921_v55 }
 0x322   : > { %2767 = vmatprep.subr.msk.bf16.mxu1 %vm3627_vm1, %v2765_v56 }
 0x328   : > { %v2989_v46 = vpop.eup %2988 }
 0x329   : > { %v608_v47 = vsel %vm505_vm0, %v2989_v46, 0.0  ;;  %v2991_v48 = vpop.eup %2990 }
 0x32a   : > { %609 = vadd.xlane.f32.xlu1 %v608_v47  ;;  %v605_v49 = vsel %vm505_vm0, %v2991_v48, 0.0 }
 0x32e   : > { %606 = vadd.xlane.f32.xlu1 %v605_v49 }
 0x33f   : > { %700 = vrot.lane.b32.xlu1 %v3640_v33, %s3287_s24 }
 0x343   : > { %702 = vrot.lane.b32.xlu1 %v3642_v34, %s3287_s24 }
 0x3b7   : > { %v610_v57 = vpop.xlane.xlu1 %609 }
 0x3b8   : > { %2992 = vrcp.f32 %v610_v57 }
 0x3bb   : > { %v607_v58 = vpop.xlane.xlu1 %606 }
 0x3bc   : > { %2994 = vrcp.f32 %v607_v58 }
 0x3bf   : > { %v701_v3 = vpop.permute.xlu1 %700 }
 0x3c2   : > { %v2993_v59 = vpop.eup %2992 }
 0x3c3   : > { %v616_v61 = vmul.f32 %v2993_v59, %v2989_v46  ;;  %v703_v4 = vpop.permute.xlu1 %702 }
 0x3c5   : > { %v618_v2 = vmul.f32 %v616_v61, %v3672_v0 }
 0x3c6   : > { %v2995_v60 = vpop.eup %2994 }
 0x3c7   : > { %v615_v63 = vmul.f32 %v2995_v60, %v2991_v48 }
 0x3c9   : > { %v617_v1 = vmul.f32 %v615_v63, %v3668_v62 }
 0x3cb   : > { %2622 = vmatprep.mubr.msk.f32.mxu1 %vm505_vm0, %v617_v1 }
 0x3cc   : > { %2623 = vmatmul.mubr.msk.f32.vlgmr.msra.gmra.mrb[2].mxu1 %vm505_vm0, %v618_v2 }
 0x3cd   : > { %2770 = vmatpush3.bf16.xpose.msk.msra.mxu1 %vm3627_vm1, %v2765_v56  ;;  %2629 = vmatprep.mubr.msk.f32.mxu1 %vm505_vm0, %v701_v3 }
 0x3d4   : > { %2630 = vmatmul.mubr.msk.f32.vlgmr.msra.gmra.mrb[4].mxu1 %vm505_vm0, %v703_v4 }
 0x49f   : > { %v3682_v5 = vpop.f32.mrb[2].mxu1 }
 0x4a0   : > { %v3684_v6 = vpop.f32.mrb[3].mxu1 }
 0x4a7   : > { %v2631_v7 = vpop.f32.mrb[4].mxu1 }
 0x4a8   : > { %v782_v8 = vpop.f32.mrb[5].mxu1  ;;  %v794_v9 = vsel %vm505_vm0, %v2631_v7, -inf }
 0x4a9   : > { %795 = vmax.xlane.f32.xlu0 %v794_v9  ;;  %v791_v10 = vsel %vm505_vm0, %v782_v8, -inf }
 0x4aa   : > { %792 = vmax.xlane.f32.xlu1 %v791_v10 }
 0x4bb   : > { %2924 = vrot.lane.b32.xlu1 %v3688_v12, %s3287_s24 }
 0x4bf   : > { %2929 = vrot.lane.b32.xlu1 %v3650_v39, %s3288_s25 }
 0x4c3   : > { %819 = vrot.lane.b32.xlu1 %v3672_v0, %s3287_s24 }
 0x4c7   : > { %914 = vrot.lane.b32.xlu1 %v3640_v33, %s3288_s25 }
 0x4cb   : > { %916 = vrot.lane.b32.xlu1 %v3642_v34, %s3288_s25 }
 0x4cf   : > { %1126 = vrot.lane.b32.xlu1 %v3642_v34, %s3289_s18 }
 0x536   : > { %v796_v13 = vpop.xlane.xlu0 %795 }
 0x537   : > { %v798_v14 = vsub.f32 %v2631_v7, %v796_v13  ;;  %v793_v15 = vpop.xlane.xlu1 %792 }
 0x538   : > { %v797_v16 = vsub.f32 %v782_v8, %v793_v15 }
 0x539   : > { %v801_v17 = vmul.f32 1.442695, %v798_v14 }
 0x53a   : > { %v799_v18 = vmul.f32 1.442695, %v797_v16 }
 0x53b   : > { %2996 = vpow2.f32 %v801_v17  ;;  %v2925_v19 = vpop.permute.xlu1 %2924 }
 0x53c   : > { %v2927_v20 = vunpack.i.h.bf16 %v2925_v19  ;;  %v2926_v21 = vunpack.i.l.bf16 %v2925_v19  ;;  %2998 = vpow2.f32 %v799_v18 }
 0x53e   : > { %v2771_v22 = vpack.c.bf16 %v2927_v20, %v2926_v21 }
 0x53f   : > { %v2930_v23 = vpop.permute.xlu1 %2929 }
 0x540   : > { %v2932_v24 = vunpack.i.h.bf16 %v2930_v23  ;;  %v2931_v25 = vunpack.i.l.bf16 %v2930_v23  ;;  %2772 = vmatprep.subr.bf16.mxu1 %v2771_v22 }
 0x541   : > { %2774 = vmatpush3.bf16.msra.mxu1 %v2771_v22 }
 0x542   : > { %v2775_v26 = vpack.c.bf16 %v2932_v24, %v2931_v25 }
 0x543   : > { %v820_v40 = vpop.permute.xlu1 %819 }
 0x544   : > { %2777 = vmatprep.subr.msk.bf16.mxu1 %vm3627_vm1, %v2775_v26 }
 0x545   : > { %v2997_v27 = vpop.eup %2996 }
 0x546   : > { %v806_v28 = vsel %vm505_vm0, %v2997_v27, 0.0  ;;  %v2999_v29 = vpop.eup %2998 }
 0x547   : > { %807 = vadd.xlane.f32.xlu0 %v806_v28  ;;  %v803_v30 = vsel %vm505_vm0, %v2999_v29, 0.0  ;;  %v915_v48 = vpop.permute.xlu1 %914 }
 0x54b   : > { %804 = vadd.xlane.f32.xlu0 %v803_v30  ;;  %v917_v49 = vpop.permute.xlu1 %916 }
 0x54f   : > { %v1127_v51 = vpop.permute.xlu1 %1126 }
 0x561   : > { %817 = vrot.lane.b32.xlu0 %v3668_v62, %s3287_s24 }
 0x565   : > { %2934 = vrot.lane.b32.xlu0 %v3650_v39, %s3289_s18 }
 0x569   : > { %1124 = vrot.lane.b32.xlu0 %v3640_v33, %s3289_s18 }
 0x5d4   : > { %v808_v31 = vpop.xlane.xlu0 %807 }
 0x5d5   : > { %3000 = vrcp.f32 %v808_v31 }
 0x5d8   : > { %v805_v32 = vpop.xlane.xlu0 %804 }
 0x5d9   : > { %3002 = vrcp.f32 %v805_v32 }
 0x5dc   : > { %v818_v35 = vpop.permute.xlu0 %817 }
 0x5df   : > { %v3001_v36 = vpop.eup %3000 }
 0x5e0   : > { %v2935_v37 = vpop.permute.xlu0 %2934  ;;  %v814_v41 = vmul.f32 %v3001_v36, %v2997_v27 }
 0x5e1   : > { %v2937_v42 = vunpack.i.h.bf16 %v2935_v37  ;;  %v2936_v43 = vunpack.i.l.bf16 %v2935_v37 }
 0x5e2   : > { %v824_v47 = vmul.f32 %v820_v40, %v814_v41 }
 0x5e3   : > { %v3003_v38 = vpop.eup %3002  ;;  %v2785_v46 = vpack.c.bf16 %v2937_v42, %v2936_v43 }
 0x5e4   : > { %v813_v44 = vmul.f32 %v3003_v38, %v2999_v29  ;;  %v1125_v50 = vpop.permute.xlu0 %1124 }
 0x5e6   : > { %v823_v45 = vmul.f32 %v818_v35, %v813_v44 }
 0x5e8   : > { %2636 = vmatprep.mubr.msk.f32.mxu1 %vm505_vm0, %v823_v45 }
 0x5e9   : > { %2637 = vmatmul.mubr.msk.f32.vlgmr.msra.gmra.mrb[6].mxu1 %vm505_vm0, %v824_v47 }
 0x5ea   : > { %2780 = vmatpush3.bf16.xpose.msk.msra.mxu1 %vm3627_vm1, %v2775_v26  ;;  %2643 = vmatprep.mubr.msk.f32.mxu1 %vm505_vm0, %v915_v48 }
 0x5eb   : > { %2787 = vmatprep.subr.msk.bf16.mxu1 %vm3627_vm1, %v2785_v46 }
 0x5f1   : > { %2644 = vmatmul.mubr.msk.f32.vlgmr.msra.gmra.mrb[8].mxu1 %vm505_vm0, %v917_v49 }
 0x5f2   : > { %2790 = vmatpush3.bf16.xpose.msk.msra.mxu1 %vm3627_vm1, %v2785_v46  ;;  %2657 = vmatprep.mubr.msk.f32.mxu1 %vm505_vm0, %v1125_v50 }
 0x5f9   : > { %2658 = vmatmul.mubr.msk.f32.vlgmr.msra.gmra.mrb[10].mxu1 %vm505_vm0, %v1127_v51 }
 0x6bc   : > { %v3724_v52 = vpop.f32.mrb[6].mxu1 }
 0x6bd   : > { %v3726_v53 = vpop.f32.mrb[7].mxu1 }
 0x6c4   : > { %v2645_v54 = vpop.f32.mrb[8].mxu1 }
 0x6c5   : > { %v996_v55 = vpop.f32.mrb[9].mxu1  ;;  %v1008_v56 = vsel %vm505_vm0, %v2645_v54, -inf }
 0x6c6   : > { %1009 = vmax.xlane.f32.xlu1 %v1008_v56  ;;  %v1005_v57 = vsel %vm505_vm0, %v996_v55, -inf }
 0x6c7   : > { %1006 = vmax.xlane.f32.xlu0 %v1005_v57 }
 0x6cc   : > { %v2659_v58 = vpop.f32.mrb[10].mxu1 }
 0x6cd   : > { %v1206_v59 = vpop.f32.mrb[11].mxu1  ;;  %v1218_v60 = vsel %vm505_vm0, %v2659_v58, -inf }
 0x6ce   : > { %1219 = vmax.xlane.f32.xlu0 %v1218_v60  ;;  %v1215_v61 = vsel %vm505_vm0, %v1206_v59, -inf }
 0x6d2   : > { %1216 = vmax.xlane.f32.xlu0 %v1215_v61 }
 0x6d7   : > { %1029 = vrot.lane.b32.xlu1 %v3668_v62, %s3288_s25 }
 0x6db   : > { %2944 = vrot.lane.b32.xlu1 %v3688_v12, %s3289_s18 }
 0x6df   : > { %1031 = vrot.lane.b32.xlu1 %v3672_v0, %s3288_s25 }
 0x6e8   : > { %2939 = vrot.lane.b32.xlu0 %v3688_v12, %s3288_s25 }
 0x753   : > { %v1010_v63 = vpop.xlane.xlu1 %1009 }
 0x754   : > { %v1012_v1 = vsub.f32 %v2645_v54, %v1010_v63  ;;  %v1007_v2 = vpop.xlane.xlu0 %1006 }
 0x755   : > { %v1011_v3 = vsub.f32 %v996_v55, %v1007_v2 }
 0x756   : > { %v1015_v4 = vmul.f32 1.442695, %v1012_v1 }
 0x757   : > { %v1013_v7 = vmul.f32 1.442695, %v1011_v3  ;;  %v1030_v8 = vpop.permute.xlu1 %1029 }
 0x758   : > { %3004 = vpow2.f32 %v1015_v4 }
 0x759   : > { %3006 = vpow2.f32 %v1013_v7 }
 0x75b   : > { %v1220_v9 = vpop.xlane.xlu0 %1219  ;;  %v2945_v13 = vpop.permute.xlu1 %2944 }
 0x75c   : > { %v2947_v15 = vunpack.i.h.bf16 %v2945_v13  ;;  %v2946_v16 = vunpack.i.l.bf16 %v2945_v13  ;;  %v1222_v25 = vsub.f32 %v2659_v58, %v1220_v9 }
 0x75e   : > { %v2791_v24 = vpack.c.bf16 %v2947_v15, %v2946_v16  ;;  %v1225_v27 = vmul.f32 1.442695, %v1222_v25 }
 0x75f   : > { %v1217_v10 = vpop.xlane.xlu0 %1216  ;;  %v1032_v35 = vpop.permute.xlu1 %1031 }
 0x760   : > { %v1221_v26 = vsub.f32 %v1206_v59, %v1217_v10  ;;  %3008 = vpow2.f32 %v1225_v27 }
 0x762   : > { %v3005_v14 = vpop.eup %3004  ;;  %v1223_v28 = vmul.f32 1.442695, %v1221_v26 }
 0x763   : > { %v3007_v17 = vpop.eup %3006  ;;  %v1020_v18 = vsel %vm505_vm0, %v3005_v14, 0.0  ;;  %v2940_v19 = vpop.permute.xlu0 %2939 }
 0x764   : > { %1021 = vadd.xlane.f32.xlu1 %v1020_v18  ;;  %v1017_v20 = vsel %vm505_vm0, %v3007_v17, 0.0  ;;  %v2942_v21 = vunpack.i.h.bf16 %v2940_v19  ;;  %v2941_v22 = vunpack.i.l.bf16 %v2940_v19  ;;  %3010 = vpow2.f32 %v1223_v28 }
 0x765   : > { %1018 = vadd.xlane.f32.xlu0 %v1017_v20 }
 0x766   : > { %v2781_v23 = vpack.c.bf16 %v2942_v21, %v2941_v22 }
 0x768   : > { %2782 = vmatprep.subr.bf16.mxu0 %v2781_v23 }
 0x769   : > { %2784 = vmatpush3.bf16.msra.mxu0 %v2781_v23 }
 0x76a   : > { %2792 = vmatprep.subr.bf16.mxu0 %v2791_v24  ;;  %v3009_v29 = vpop.eup %3008 }
 0x76b   : > { %v1230_v31 = vsel %vm505_vm0, %v3009_v29, 0.0 }
 0x76e   : > { %v3011_v30 = vpop.eup %3010 }
 0x76f   : > { %v1227_v32 = vsel %vm505_vm0, %v3011_v30, 0.0 }
 0x775   : > { %2949 = vrot.lane.b32.xlu1 %v3650_v39, %s3290_s9 }
 0x77b   : > { %1239 = vrot.lane.b32.xlu0 %v3668_v62, %s3289_s18 }
 0x799   : > { %1231 = vadd.xlane.f32.xlu1 %v1230_v31 }
 0x79a   : > { %1228 = vadd.xlane.f32.xlu0 %v1227_v32 }
 0x7aa   : > { %1334 = vrot.lane.b32.xlu1 %v3640_v33, %s3290_s9 }
 0x7b0   : > { %1241 = vrot.lane.b32.xlu0 %v3672_v0, %s3289_s18 }
 0x7b4   : > { %1336 = vrot.lane.b32.xlu0 %v3642_v34, %s3290_s9 }
 0x7f1   : > { %v1022_v36 = vpop.xlane.xlu1 %1021 }
 0x7f2   : > { %3012 = vrcp.f32 %v1022_v36  ;;  %v1019_v37 = vpop.xlane.xlu0 %1018 }
 0x7f3   : > { %3014 = vrcp.f32 %v1019_v37 }
 0x7f5   : > { %v2950_v40 = vpop.permute.xlu1 %2949 }
 0x7f6   : > { %v2952_v44 = vunpack.i.h.bf16 %v2950_v40  ;;  %v2951_v45 = vunpack.i.l.bf16 %v2950_v40  ;;  %v1240_v49 = vpop.permute.xlu0 %1239 }
 0x7f8   : > { %v2795_v48 = vpack.c.bf16 %v2952_v44, %v2951_v45 }
 0x7fc   : > { %v3013_v38 = vpop.eup %3012 }
 0x7fd   : > { %v3015_v41 = vpop.eup %3014  ;;  %v1028_v42 = vmul.f32 %v3013_v38, %v3005_v14 }
 0x7fe   : > { %v1027_v43 = vmul.f32 %v3015_v41, %v3007_v17 }
 0x7ff   : > { %v1036_v47 = vmul.f32 %v1032_v35, %v1028_v42 }
 0x800   : > { %v1035_v46 = vmul.f32 %v1030_v8, %v1027_v43 }
 0x802   : > { %2650 = vmatprep.mubr.msk.f32.mxu0 %vm505_vm0, %v1035_v46 }
 0x803   : > { %2651 = vmatmul.mubr.msk.f32.vlgmr.msra.gmra.mrb[2].mxu0 %vm505_vm0, %v1036_v47 }
 0x804   : > { %2794 = vmatpush3.bf16.msra.mxu0 %v2791_v24 }
 0x805   : > { %2797 = vmatprep.subr.msk.bf16.mxu0 %vm3627_vm1, %v2795_v48 }
 0x826   : > { %v1232_v50 = vpop.xlane.xlu1 %1231 }
 0x827   : > { %3016 = vrcp.f32 %v1232_v50  ;;  %v1229_v51 = vpop.xlane.xlu0 %1228 }
 0x828   : > { %3018 = vrcp.f32 %v1229_v51 }
 0x82a   : > { %v1335_v61 = vpop.permute.xlu1 %1334 }
 0x82b   : > { %v1242_v58 = vpop.permute.xlu0 %1241 }
 0x82f   : > { %v1337_v63 = vpop.permute.xlu0 %1336 }
 0x831   : > { %v3017_v54 = vpop.eup %3016 }
 0x832   : > { %v3019_v55 = vpop.eup %3018  ;;  %v1238_v56 = vmul.f32 %v3017_v54, %v3009_v29 }
 0x833   : > { %v1237_v57 = vmul.f32 %v3019_v55, %v3011_v30 }
 0x834   : > { %v1246_v60 = vmul.f32 %v1242_v58, %v1238_v56 }
 0x835   : > { %v1245_v59 = vmul.f32 %v1240_v49, %v1237_v57 }
 0x837   : > { %2664 = vmatprep.mubr.msk.f32.mxu0 %vm505_vm0, %v1245_v59 }
 0x838   : > { %2665 = vmatmul.mubr.msk.f32.vlgmr.msra.gmra.mrb[4].mxu0 %vm505_vm0, %v1246_v60 }
 0x839   : > { %2800 = vmatpush3.bf16.xpose.msk.msra.mxu0 %vm3627_vm1, %v2795_v48  ;;  %2671 = vmatprep.mubr.msk.f32.mxu0 %vm505_vm0, %v1335_v61 }
 0x840   : > { %2672 = vmatmul.mubr.msk.f32.vlgmr.msra.gmra.mrb[6].mxu0 %vm505_vm0, %v1337_v63 }
 0x8d6   : > { %v3764_v1 = vpop.f32.mrb[2].mxu0 }
 0x8d7   : > { %v3766_v2 = vpop.f32.mrb[3].mxu0 }
 0x90b   : > { %v3768_v3 = vpop.f32.mrb[4].mxu0 }
 0x90c   : > { %v3770_v4 = vpop.f32.mrb[5].mxu0 }
 0x913   : > { %v2673_v7 = vpop.f32.mrb[6].mxu0 }
 0x914   : > { %v1416_v8 = vpop.f32.mrb[7].mxu0  ;;  %v1428_v9 = vsel %vm505_vm0, %v2673_v7, -inf }
 0x915   : > { %1429 = vmax.xlane.f32.xlu0 %v1428_v9  ;;  %v1425_v10 = vsel %vm505_vm0, %v1416_v8, -inf }
 0x916   : > { %1426 = vmax.xlane.f32.xlu1 %v1425_v10 }
 0x927   : > { %2954 = vrot.lane.b32.xlu1 %v3688_v12, %s3290_s9 }
 0x92b   : > { %2959 = vrot.lane.b32.xlu1 %v3650_v39, %s3291_s0 }
 0x92f   : > { %1451 = vrot.lane.b32.xlu1 %v3672_v0, %s3290_s9 }
 0x933   : > { %1544 = vrot.lane.b32.xlu1 %v3640_v33, %s3291_s0 }
 0x9a2   : > { %v1430_v13 = vpop.xlane.xlu0 %1429 }
 0x9a3   : > { %v1432_v14 = vsub.f32 %v2673_v7, %v1430_v13  ;;  %v1427_v15 = vpop.xlane.xlu1 %1426 }
 0x9a4   : > { %v1431_v16 = vsub.f32 %v1416_v8, %v1427_v15 }
 0x9a5   : > { %v1435_v17 = vmul.f32 1.442695, %v1432_v14 }
 0x9a6   : > { %v1433_v18 = vmul.f32 1.442695, %v1431_v16 }
 0x9a7   : > { %3020 = vpow2.f32 %v1435_v17  ;;  %v2955_v19 = vpop.permute.xlu1 %2954 }
 0x9a8   : > { %v2957_v20 = vunpack.i.h.bf16 %v2955_v19  ;;  %v2956_v21 = vunpack.i.l.bf16 %v2955_v19  ;;  %3022 = vpow2.f32 %v1433_v18 }
 0x9aa   : > { %v2801_v22 = vpack.c.bf16 %v2957_v20, %v2956_v21 }
 0x9ab   : > { %v2960_v23 = vpop.permute.xlu1 %2959 }
 0x9ac   : > { %v2962_v24 = vunpack.i.h.bf16 %v2960_v23  ;;  %v2961_v25 = vunpack.i.l.bf16 %v2960_v23  ;;  %2802 = vmatprep.subr.bf16.mxu1 %v2801_v22 }
 0x9ad   : > { %2804 = vmatpush3.bf16.msra.mxu1 %v2801_v22 }
 0x9ae   : > { %v2805_v26 = vpack.c.bf16 %v2962_v24, %v2961_v25 }
 0x9af   : > { %v1452_v37 = vpop.permute.xlu1 %1451 }
 0x9b0   : > { %2807 = vmatprep.subr.msk.bf16.mxu1 %vm3627_vm1, %v2805_v26 }
 0x9b1   : > { %v3021_v27 = vpop.eup %3020 }
 0x9b2   : > { %v1440_v28 = vsel %vm505_vm0, %v3021_v27, 0.0  ;;  %v3023_v29 = vpop.eup %3022 }
 0x9b3   : > { %1441 = vadd.xlane.f32.xlu0 %v1440_v28  ;;  %v1437_v30 = vsel %vm505_vm0, %v3023_v29, 0.0  ;;  %v1545_v44 = vpop.permute.xlu1 %1544 }
 0x9b7   : > { %1438 = vadd.xlane.f32.xlu0 %v1437_v30 }
 0x9cd   : > { %1449 = vrot.lane.b32.xlu0 %v3668_v62, %s3290_s9 }
 0x9d1   : > { %1546 = vrot.lane.b32.xlu0 %v3642_v34, %s3291_s0 }
 0xa40   : > { %v1442_v31 = vpop.xlane.xlu0 %1441 }
 0xa41   : > { %3024 = vrcp.f32 %v1442_v31 }
 0xa44   : > { %v1439_v32 = vpop.xlane.xlu0 %1438 }
 0xa45   : > { %3026 = vrcp.f32 %v1439_v32 }
 0xa48   : > { %v1450_v41 = vpop.permute.xlu0 %1449 }
 0xa4b   : > { %v3025_v35 = vpop.eup %3024 }
 0xa4c   : > { %v1448_v38 = vmul.f32 %v3025_v35, %v3021_v27  ;;  %v1547_v45 = vpop.permute.xlu0 %1546 }
 0xa4e   : > { %v1456_v43 = vmul.f32 %v1452_v37, %v1448_v38 }
 0xa4f   : > { %v3027_v36 = vpop.eup %3026 }
 0xa50   : > { %v1447_v40 = vmul.f32 %v3027_v36, %v3023_v29 }
 0xa52   : > { %v1455_v42 = vmul.f32 %v1450_v41, %v1447_v40 }
 0xa54   : > { %2678 = vmatprep.mubr.msk.f32.mxu1 %vm505_vm0, %v1455_v42 }
 0xa55   : > { %2679 = vmatmul.mubr.msk.f32.vlgmr.msra.gmra.mrb[12].mxu1 %vm505_vm0, %v1456_v43 }
 0xa56   : > { %2810 = vmatpush3.bf16.xpose.msk.msra.mxu1 %vm3627_vm1, %v2805_v26  ;;  %2685 = vmatprep.mubr.msk.f32.mxu1 %vm505_vm0, %v1545_v44 }
 0xa5d   : > { %2686 = vmatmul.mubr.msk.f32.vlgmr.msra.gmra.mrb[14].mxu1 %vm505_vm0, %v1547_v45 }
 0xb28   : > { %v3796_v46 = vpop.f32.mrb[12].mxu1 }
 0xb29   : > { %v3798_v47 = vpop.f32.mrb[13].mxu1 }
 0xb30   : > { %v2687_v48 = vpop.f32.mrb[14].mxu1 }
 0xb31   : > { %v1626_v49 = vpop.f32.mrb[15].mxu1  ;;  %v1638_v50 = vsel %vm505_vm0, %v2687_v48, -inf }
 0xb32   : > { %1639 = vmax.xlane.f32.xlu0 %v1638_v50  ;;  %v1635_v51 = vsel %vm505_vm0, %v1626_v49, -inf }
 0xb33   : > { %1636 = vmax.xlane.f32.xlu1 %v1635_v51 }
 0xb44   : > { %2964 = vrot.lane.b32.xlu1 %v3688_v12, %s3291_s0 }
 0xb48   : > { %2969 = vrot.lane.b32.xlu1 %v3650_v39, %s3292_s30 }
 0xb4c   : > { %1661 = vrot.lane.b32.xlu1 %v3672_v0, %s3291_s0 }
 0xb50   : > { %1754 = vrot.lane.b32.xlu1 %v3640_v33, %s3292_s30 }
 0xbbf   : > { %v1640_v54 = vpop.xlane.xlu0 %1639 }
 0xbc0   : > { %v1642_v55 = vsub.f32 %v2687_v48, %v1640_v54  ;;  %v1637_v56 = vpop.xlane.xlu1 %1636 }
 0xbc1   : > { %v1641_v57 = vsub.f32 %v1626_v49, %v1637_v56 }
 0xbc2   : > { %v1645_v58 = vmul.f32 1.442695, %v1642_v55 }
 0xbc3   : > { %v1643_v59 = vmul.f32 1.442695, %v1641_v57 }
 0xbc4   : > { %3028 = vpow2.f32 %v1645_v58  ;;  %v2965_v60 = vpop.permute.xlu1 %2964 }
 0xbc5   : > { %v2967_v61 = vunpack.i.h.bf16 %v2965_v60  ;;  %v2966_v63 = vunpack.i.l.bf16 %v2965_v60  ;;  %3030 = vpow2.f32 %v1643_v59 }
 0xbc7   : > { %v2811_v7 = vpack.c.bf16 %v2967_v61, %v2966_v63 }
 0xbc8   : > { %v2970_v8 = vpop.permute.xlu1 %2969 }
 0xbc9   : > { %v2972_v9 = vunpack.i.h.bf16 %v2970_v8  ;;  %v2971_v10 = vunpack.i.l.bf16 %v2970_v8  ;;  %2812 = vmatprep.subr.bf16.mxu0 %v2811_v7 }
 0xbca   : > { %2814 = vmatpush3.bf16.msra.mxu0 %v2811_v7 }
 0xbcb   : > { %v2815_v13 = vpack.c.bf16 %v2972_v9, %v2971_v10 }
 0xbcc   : > { %v1662_v22 = vpop.permute.xlu1 %1661 }
 0xbcd   : > { %2817 = vmatprep.subr.msk.bf16.mxu0 %vm3627_vm1, %v2815_v13 }
 0xbce   : > { %v3029_v14 = vpop.eup %3028 }
 0xbcf   : > { %v1650_v15 = vsel %vm505_vm0, %v3029_v14, 0.0  ;;  %v3031_v16 = vpop.eup %3030 }
 0xbd0   : > { %1651 = vadd.xlane.f32.xlu0 %v1650_v15  ;;  %v1647_v17 = vsel %vm505_vm0, %v3031_v16, 0.0  ;;  %v1755_v28 = vpop.permute.xlu1 %1754 }
 0xbd4   : > { %1648 = vadd.xlane.f32.xlu0 %v1647_v17 }
 0xbea   : > { %1659 = vrot.lane.b32.xlu0 %v3668_v62, %s3291_s0 }
 0xbee   : > { %1756 = vrot.lane.b32.xlu0 %v3642_v34, %s3292_s30 }
 0xc5d   : > { %v1652_v18 = vpop.xlane.xlu0 %1651 }
 0xc5e   : > { %3032 = vrcp.f32 %v1652_v18 }
 0xc61   : > { %v1649_v19 = vpop.xlane.xlu0 %1648 }
 0xc62   : > { %3034 = vrcp.f32 %v1649_v19 }
 0xc65   : > { %v1660_v25 = vpop.permute.xlu0 %1659 }
 0xc68   : > { %v3033_v20 = vpop.eup %3032 }
 0xc69   : > { %v1658_v23 = vmul.f32 %v3033_v20, %v3029_v14  ;;  %v1757_v29 = vpop.permute.xlu0 %1756 }
 0xc6b   : > { %v1666_v27 = vmul.f32 %v1662_v22, %v1658_v23 }
 0xc6c   : > { %v3035_v21 = vpop.eup %3034 }
 0xc6d   : > { %v1657_v24 = vmul.f32 %v3035_v21, %v3031_v16 }
 0xc6f   : > { %v1665_v26 = vmul.f32 %v1660_v25, %v1657_v24 }
 0xc71   : > { %2692 = vmatprep.mubr.msk.f32.mxu0 %vm505_vm0, %v1665_v26 }
 0xc72   : > { %2693 = vmatmul.mubr.msk.f32.vlgmr.msra.gmra.mrb[8].mxu0 %vm505_vm0, %v1666_v27 }
 0xc73   : > { %2820 = vmatpush3.bf16.xpose.msk.msra.mxu0 %vm3627_vm1, %v2815_v13  ;;  %2699 = vmatprep.mubr.msk.f32.mxu0 %vm505_vm0, %v1755_v28 }
 0xc7a   : > { %2700 = vmatmul.mubr.msk.f32.vlgmr.msra.gmra.mrb[10].mxu0 %vm505_vm0, %v1757_v29 }
 0xd45   : > { %v3824_v30 = vpop.f32.mrb[8].mxu0 }
 0xd46   : > { %v3826_v31 = vpop.f32.mrb[9].mxu0 }
 0xd4d   : > { %v2701_v32 = vpop.f32.mrb[10].mxu0 }
 0xd4e   : > { %v1836_v35 = vpop.f32.mrb[11].mxu0  ;;  %v1848_v36 = vsel %vm505_vm0, %v2701_v32, -inf }
 0xd4f   : > { %1849 = vmax.xlane.f32.xlu0 %v1848_v36  ;;  %v1845_v37 = vsel %vm505_vm0, %v1836_v35, -inf }
 0xd50   : > { %1846 = vmax.xlane.f32.xlu1 %v1845_v37 }
 0xd61   : > { %2974 = vrot.lane.b32.xlu1 %v3688_v12, %s3292_s30 }
 0xd65   : > { %2979 = vrot.lane.b32.xlu1 %v3650_v39, %s3293_s12 }
 0xd69   : > { %1871 = vrot.lane.b32.xlu1 %v3672_v0, %s3292_s30 }
 0xd6d   : > { %1964 = vrot.lane.b32.xlu1 %v3640_v33, %s3293_s12 }
 0xddc   : > { %v1850_v38 = vpop.xlane.xlu0 %1849 }
 0xddd   : > { %v1852_v40 = vsub.f32 %v2701_v32, %v1850_v38  ;;  %v1847_v41 = vpop.xlane.xlu1 %1846 }
 0xdde   : > { %v1851_v42 = vsub.f32 %v1836_v35, %v1847_v41 }
 0xddf   : > { %v1855_v43 = vmul.f32 1.442695, %v1852_v40 }
 0xde0   : > { %v1853_v44 = vmul.f32 1.442695, %v1851_v42 }
 0xde1   : > { %3036 = vpow2.f32 %v1855_v43  ;;  %v2975_v45 = vpop.permute.xlu1 %2974 }
 0xde2   : > { %v2977_v48 = vunpack.i.h.bf16 %v2975_v45  ;;  %v2976_v49 = vunpack.i.l.bf16 %v2975_v45  ;;  %3038 = vpow2.f32 %v1853_v44 }
 0xde4   : > { %v2821_v50 = vpack.c.bf16 %v2977_v48, %v2976_v49 }
 0xde5   : > { %v2980_v51 = vpop.permute.xlu1 %2979 }
 0xde6   : > { %v2982_v39 = vunpack.i.h.bf16 %v2980_v51  ;;  %v2981_v54 = vunpack.i.l.bf16 %v2980_v51  ;;  %2822 = vmatprep.subr.bf16.mxu1 %v2821_v50 }
 0xde7   : > { %2824 = vmatpush3.bf16.msra.mxu1 %v2821_v50 }
 0xde8   : > { %v2825_v55 = vpack.c.bf16 %v2982_v39, %v2981_v54 }
 0xde9   : > { %v1872_v7 = vpop.permute.xlu1 %1871 }
 0xdea   : > { %2827 = vmatprep.subr.msk.bf16.mxu1 %vm3627_vm1, %v2825_v55 }
 0xdeb   : > { %v3037_v33 = vpop.eup %3036 }
 0xdec   : > { %v1860_v56 = vsel %vm505_vm0, %v3037_v33, 0.0  ;;  %v3039_v57 = vpop.eup %3038 }
 0xded   : > { %1861 = vadd.xlane.f32.xlu0 %v1860_v56  ;;  %v1857_v58 = vsel %vm505_vm0, %v3039_v57, 0.0  ;;  %v1965_v15 = vpop.permute.xlu1 %1964 }
 0xdf1   : > { %1858 = vadd.xlane.f32.xlu0 %v1857_v58 }
 0xe07   : > { %1869 = vrot.lane.b32.xlu0 %v3668_v62, %s3292_s30 }
 0xe0b   : > { %1966 = vrot.lane.b32.xlu0 %v3642_v34, %s3293_s12 }
 0xe7a   : > { %v1862_v59 = vpop.xlane.xlu0 %1861 }
 0xe7b   : > { %3040 = vrcp.f32 %v1862_v59 }
 0xe7e   : > { %v1859_v60 = vpop.xlane.xlu0 %1858 }
 0xe7f   : > { %3042 = vrcp.f32 %v1859_v60 }
 0xe82   : > { %v1870_v10 = vpop.permute.xlu0 %1869 }
 0xe85   : > { %v3041_v61 = vpop.eup %3040 }
 0xe86   : > { %v1868_v8 = vmul.f32 %v3041_v61, %v3037_v33  ;;  %v1967_v34 = vpop.permute.xlu0 %1966 }
 0xe88   : > { %v1876_v14 = vmul.f32 %v1872_v7, %v1868_v8 }
 0xe89   : > { %v3043_v63 = vpop.eup %3042 }
 0xe8a   : > { %v1867_v9 = vmul.f32 %v3043_v63, %v3039_v57 }
 0xe8c   : > { %v1875_v13 = vmul.f32 %v1870_v10, %v1867_v9 }
 0xe8e   : > { %2706 = vmatprep.mubr.msk.f32.mxu1 %vm505_vm0, %v1875_v13 }
 0xe8f   : > { %2707 = vmatmul.mubr.msk.f32.vlgmr.msra.gmra.mrb[16].mxu1 %vm505_vm0, %v1876_v14 }
 0xe90   : > { %2830 = vmatpush3.bf16.xpose.msk.msra.mxu1 %vm3627_vm1, %v2825_v55  ;;  %2713 = vmatprep.mubr.msk.f32.mxu1 %vm505_vm0, %v1965_v15 }
 0xe97   : > { %2714 = vmatmul.mubr.msk.f32.vlgmr.msra.gmra.mrb[18].mxu1 %vm505_vm0, %v1967_v34 }
 0xf62   : > { %v2708_v16 = vpop.f32.mrb[16].mxu1 }
 0xf63   : > { %v1955_v17 = vpop.f32.mrb[17].mxu1 }
 0xf6a   : > { %v2715_v18 = vpop.f32.mrb[18].mxu1 }
 0xf6b   : > { %v2046_v19 = vpop.f32.mrb[19].mxu1  ;;  %v2058_v20 = vsel %vm505_vm0, %v2715_v18, -inf }
 0xf6c   : > { %2059 = vmax.xlane.f32.xlu0 %v2058_v20  ;;  %v2055_v21 = vsel %vm505_vm0, %v2046_v19, -inf }
 0xf6d   : > { %2056 = vmax.xlane.f32.xlu1 %v2055_v21 }
 0xf7e   : > { %2984 = vrot.lane.b32.xlu1 %v3688_v12, %s3293_s12 }
 0xf82   : > { %2081 = vrot.lane.b32.xlu1 %v3672_v0, %s3293_s12 }
 0xf86   : > { %2176 = vrot.lane.b32.xlu1 %v3726_v53, %s3293_s12 }
 0xf8a   : > { %2178 = vrot.lane.b32.xlu1 %v3724_v52, %s3293_s12 }
 0xf8e   : > { %2186 = vrot.lane.b32.xlu1 %v3764_v1, %s3292_s30 }
 0xf92   : > { %2194 = vrot.lane.b32.xlu1 %v3768_v3, %s3291_s0 }
 0xf96   : > { %2202 = vrot.lane.b32.xlu1 %v3796_v46, %s3290_s9 }
 0xf9a   : > { %2210 = vrot.lane.b32.xlu1 %v3824_v30, %s3289_s18 }
 0xf9e   : > { %2218 = vrot.lane.b32.xlu1 %v2708_v16, %s3288_s25 }
 0xff9   : > { %v2060_v11 = vpop.xlane.xlu0 %2059 }
 0xffa   : > { %v2062_v0 = vsub.f32 %v2715_v18, %v2060_v11  ;;  %v2057_v12 = vpop.xlane.xlu1 %2056 }
 0xffb   : > { %v2061_v53 = vsub.f32 %v2046_v19, %v2057_v12 }
 0xffc   : > { %v2065_v22 = vmul.f32 1.442695, %v2062_v0 }
 0xffd   : > { %v2063_v52 = vmul.f32 1.442695, %v2061_v53 }
 0xffe   : > { %3044 = vpow2.f32 %v2065_v22  ;;  %v2985_v23 = vpop.permute.xlu1 %2984 }
 0xfff   : > { %v2987_v1 = vunpack.i.h.bf16 %v2985_v23  ;;  %v2986_v24 = vunpack.i.l.bf16 %v2985_v23  ;;  %3046 = vpow2.f32 %v2063_v52 }
0x1001   : > { %v2831_v3 = vpack.c.bf16 %v2987_v1, %v2986_v24 }
0x1002   : > { %v2082_v36 = vpop.permute.xlu1 %2081 }
0x1003   : > { %2832 = vmatprep.subr.bf16.mxu0 %v2831_v3 }
0x1004   : > { %2834 = vmatpush3.bf16.msra.mxu0 %v2831_v3 }
0x1006   : > { %v2177_v38 = vpop.permute.xlu1 %2176 }
0x1007   : > { %v2230_v39 = vsel %vm505_vm0, %v3684_v6, %v2177_v38 }
0x1008   : > { %v3045_v46 = vpop.eup %3044 }
0x1009   : > { %v2070_v25 = vsel %vm505_vm0, %v3045_v46, 0.0  ;;  %v3047_v26 = vpop.eup %3046 }
0x100a   : > { %2071 = vadd.xlane.f32.xlu0 %v2070_v25  ;;  %v2067_v27 = vsel %vm505_vm0, %v3047_v26, 0.0  ;;  %v2179_v40 = vpop.permute.xlu1 %2178 }
0x100b   : > { %v2231_v51 = vsel %vm505_vm0, %v3682_v5, %v2179_v40 }
0x100e   : > { %2068 = vadd.xlane.f32.xlu0 %v2067_v27  ;;  %v2187_v41 = vpop.permute.xlu1 %2186 }
0x100f   : > { %v2234_v54 = vsel %vm2232_vm2, %v2231_v51, %v2187_v41 }
0x1012   : > { %v2195_v43 = vpop.permute.xlu1 %2194 }
0x1013   : > { %v2237_v33 = vsel %vm2235_vm3, %v2234_v54, %v2195_v43 }
0x1016   : > { %v2203_v45 = vpop.permute.xlu1 %2202 }
0x1017   : > { %v2240_v58 = vsel %vm2238_vm4, %v2237_v33, %v2203_v45 }
0x101a   : > { %v2211_v49 = vpop.permute.xlu1 %2210 }
0x101b   : > { %v2243_v5 = vsel %vm2241_vm5, %v2240_v58, %v2211_v49 }
0x101e   : > { %v2219_v55 = vpop.permute.xlu1 %2218 }
0x101f   : > { %v2246_v60 = vsel %vm2244_vm6, %v2243_v5, %v2219_v55 }
0x1024   : > { %2079 = vrot.lane.b32.xlu0 %v3668_v62, %s3293_s12 }
0x1028   : > { %2184 = vrot.lane.b32.xlu0 %v3766_v2, %s3292_s30 }
0x102c   : > { %2192 = vrot.lane.b32.xlu0 %v3770_v4, %s3291_s0 }
0x1030   : > { %2200 = vrot.lane.b32.xlu0 %v3798_v47, %s3290_s9 }
0x1034   : > { %2208 = vrot.lane.b32.xlu0 %v3826_v31, %s3289_s18 }
0x1038   : > { %2216 = vrot.lane.b32.xlu0 %v1955_v17, %s3288_s25 }
0x1097   : > { %v2072_v28 = vpop.xlane.xlu0 %2071 }
0x1098   : > { %3048 = vrcp.f32 %v2072_v28 }
0x109b   : > { %v2069_v29 = vpop.xlane.xlu0 %2068 }
0x109c   : > { %3050 = vrcp.f32 %v2069_v29 }
0x109f   : > { %v2080_v2 = vpop.permute.xlu0 %2079 }
0x10a2   : > { %v3049_v30 = vpop.eup %3048 }
0x10a3   : > { %v2078_v32 = vmul.f32 %v3049_v30, %v3045_v46  ;;  %v2185_v42 = vpop.permute.xlu0 %2184 }
0x10a4   : > { %v2233_v56 = vsel %vm2232_vm2, %v2230_v39, %v2185_v42 }
0x10a5   : > { %v2086_v4 = vmul.f32 %v2082_v36, %v2078_v32 }
0x10a6   : > { %v3051_v62 = vpop.eup %3050 }
0x10a7   : > { %v2077_v35 = vmul.f32 %v3051_v62, %v3047_v26  ;;  %v2193_v44 = vpop.permute.xlu0 %2192 }
0x10a8   : > { %v2236_v59 = vsel %vm2235_vm3, %v2233_v56, %v2193_v44 }
0x10a9   : > { %v2085_v37 = vmul.f32 %v2080_v2, %v2077_v35 }
0x10ab   : > { %2720 = vmatprep.mubr.msk.f32.mxu0 %vm505_vm0, %v2085_v37  ;;  %v2201_v48 = vpop.permute.xlu0 %2200 }
0x10ac   : > { %2721 = vmatmul.mubr.msk.f32.vlgmr.msra.gmra.mrb[12].mxu0 %vm505_vm0, %v2086_v4  ;;  %v2239_v6 = vsel %vm2238_vm4, %v2236_v59, %v2201_v48 }
0x10af   : > { %v2209_v50 = vpop.permute.xlu0 %2208 }
0x10b0   : > { %v2242_v61 = vsel %vm2241_vm5, %v2239_v6, %v2209_v50 }
0x10b3   : > { %v2217_v57 = vpop.permute.xlu0 %2216 }
0x10b4   : > { %v2245_v7 = vsel %vm2244_vm6, %v2242_v61, %v2217_v57 }
0x117f   : > { %v2722_v47 = vpop.f32.mrb[12].mxu0 }
0x1180   : > { %2226 = vrot.lane.b32.xlu1 %v2722_v47, %s3287_s24  ;;  %v2165_v31 = vpop.f32.mrb[13].mxu0 }
0x1181   : > { %2224 = vrot.lane.b32.xlu0 %v2165_v31, %s3287_s24 }
0x11f2   : > { %v2227_v63 = vpop.permute.xlu1 %2226 }
0x11f3   : > { %v2249_v8 = vsel %vm2247_vm7, %v2246_v60, %v2227_v63  ;;  %v2225_v9 = vpop.permute.xlu0 %2224 }
0x11f4   : > { %2251 = vst [vmem:[%s398_s29 + $0x8] sm:$0xff] %v2249_v8  ;;  %v2248_v10 = vsel %vm2247_vm7, %v2245_v7, %v2225_v9 }
0x11f5   : > { %2250 = vst [vmem:[%s398_s29] sm:$0xff] %v2248_v10 }
0x11f6   : > { %3213 = shalt.err (!%p3210_p2)
}
0x11f7   : > { %s3214_s23 = scalar_lea.hbm %s3903_s16, 256  ;;  %s3218_s20 = scalar_lea.hbm %s3955_s6, 512 }
0x11f8   : > { %p3215_p0 = scmp.ne.s32.totalorder %s3903_s16, %s3214_s23  ;;  %p3219_p13 = scmp.lt.u32.totalorder %s3903_s16, %s3955_s6 }
0x11f9   : > { %p3220_p10 = scmp.lt.u32.totalorder %s3218_s20, %s3214_s23  ;;  %p3222_p7 = scmp.lt.u32.totalorder %s3214_s23, %s3903_s16 }
0x11fa   : > { %p3216_p12 = pnand %p3215_p0, %p4006_p1 }
0x11fb   : > { %p3221_p9 = por %p3220_p10, %p3219_p13 }
0x11fc   : > { %p3217_p8 = pneg %p3216_p12 }
0x11fd   : > { %p3223_p3 = por %p3222_p7, %p3221_p9 }
0x11ff   : > { %p3224_p5 = pnand %p3223_p3, %p3217_p8 }
0x1201   : > { %3227 = shalt.err (!%p3224_p5)
}
0x1202   : > { %s3295_s28 = smov 128   ;;  %s3296_s24 = smov 8  }
0x1203   : > { %2847 = dma.vmem_to_hbm [thread:$0]  (%p4006_p1), %s3897_s11, 256, %s3903_s16, %s3907_s13, %s3295_s28, %s3295_s28, %s3296_s24  }
0x1204 PF: > { %s4007_s25 = sld [smem:[#allocation17_spill]]  ;;  %s4008_s18 = sld [smem:[#allocation22_spill]] }
0x1205   : > { %s4009_s9 = sld [smem:[#allocation19_spill]] }
0x120a   : > { %s2281_s0 = sand.u32 1, %s4007_s25   ;;  %p4010_p11 = scmp.ne.s32.totalorder %s4008_s18, 0 }
0x120b   : > { %p4011_p4 = scmp.ge.s32.totalorder %s4009_s9, 2  ;;  %s2282_s30 = scalar_lea.sflag [#allocation4], %s2281_s0 }
0x120d   : > { %p2867_p6 = pnand %p4011_p4, %p4010_p11 }
0x120f   : > { %3261 = dma.done.wait (!%p2867_p6), %s2282_s30, 256  }
0x1210   : > { %3263 = vsyncadd (!%p2867_p6), %s2282_s30, 4294967040  ;;  %s4012_s24 = sld [smem:[#allocation20_spill]]  ;;  %s4013_s12 = sld [smem:[#allocation18_spill]] }
0x1211   : > { %s4014_s23 = sld [smem:[#allocation21_spill]]  ;;  %s4015_s21 = smov %s3270_s22 }
0x1216   : > { %p23_p2 = scmp.ge.s32.totalorder %s4012_s24, 4   ;;  %s4016_s22 = smov %s4013_s12 }
0x1218   :  { %25 = sbr.rel (!%p23_p2) target bundleno = 12 (0xc), region = 128 }
0x121f   :  { %2287 = vsyncpa [#allocation3], 1 }
0x1220   :  { %2289 = vsyncpa [#allocation3 + $0x1], 1 }
0x1221   :  { %2290 = vsyncpa [#allocation6], 1 }
0x1222   :  { %2292 = vsyncpa [#allocation6 + $0x1], 1 }
0x1223   :  { %2293 = vsyncpa [#allocation9], 1 }
0x1224   :  { %2294 = vsyncpa [#allocation4], 1 }
0x1225   :  { %2296 = vsyncpa [#allocation4 + $0x1], 1 }

</bundles_post_ra>
